<compile_context>
chip_gen: v7x
topology: tpu7x:2x2x1
jax: 0.10.0
libtpu: 0.0.40
codegen_flags: <defaults>
</compile_context>

<pallas_src>
import functools
from typing import NamedTuple

import jax
import jax.numpy as jnp
import numpy as np
from jax.experimental import pallas as pl
from jax.experimental.pallas import tpu as pltpu

_LANE = 128


def _round_up(x, m):
    return -(-x // m) * m


# ----------------------------------------------------------------------------
# Static geometry.
# ----------------------------------------------------------------------------
class _ConvGeom(NamedTuple):
    H: int
    W: int
    Cin: int
    Cout: int
    K: int
    pad: int
    Ho: int   # conv output height
    Wo: int   # conv output width
    Hq: int   # pooled output height (floor)
    Wq: int   # pooled output width (floor)


def _conv_geom(H, W, w_oihw, pad=1):
    Cout, Cin, K, _ = w_oihw.shape
    Ho = H + 2 * pad - K + 1
    Wo = W + 2 * pad - K + 1
    return _ConvGeom(H, W, Cin, Cout, K, pad, Ho, Wo, Ho // 2, Wo // 2)


class _StageDims(NamedTuple):
    KH: int         # number of conv taps along H
    rows_in: int    # B * H_in  (M of the main matmuls)
    k_in: int       # input lane count (K of the main matmuls)
    pool_rows: int  # B * Hq    (rows after the 2x2 pool)
    lane_pad: int   # Wq * Cout padded to a multiple of 128


# ----------------------------------------------------------------------------
# Trace-time weight repacking (all static w.r.t. activations).
# ----------------------------------------------------------------------------
def _pooled_conv_weights(w_oihw, W_in, pad):
    """Per-W-parity block-Toeplitz conv matrices: (2, KH, W_in*Cin, Wq*Cout).

    [0] produces the even (w=2q) conv output columns, [1] the odd (w=2q+1) ones,
    directly in the packed (q*Cout + co) lane layout; W zero-padding folded in.
    """
    Cout, Cin, KH, KW = w_oihw.shape
    Wo = W_in + 2 * pad - KW + 1
    Wq = Wo // 2
    j = jnp.arange(W_in)[:, None, None]           # input column
    q = jnp.arange(Wq)[None, :, None]             # pooled output column
    par = jnp.arange(2)[None, None, :]            # even / odd conv column
    dw = j + pad - (2 * q + par)                  # kernel tap index, (W_in, Wq, 2)
    valid = (dw >= 0) & (dw < KW)
    taps = jnp.transpose(w_oihw, (2, 1, 0, 3))    # (KH, Cin, Cout, KW)
    g = taps[:, :, :, jnp.clip(dw, 0, KW - 1)]    # (KH, Cin, Cout, W_in, Wq, 2)
    g = jnp.where(valid[None, None, None], g, 0.0)
    g = jnp.transpose(g, (5, 0, 3, 1, 4, 2))      # (2, KH, W_in, Cin, Wq, Cout)
    return g.reshape(2, KH, W_in * Cin, Wq * Cout).astype(jnp.float32)


def _merged_conv_weights(w_oihw, W_in, pad, k_rows, lane_pad):
    """(KH, k_rows, 2*lane_pad): even|odd W-parity merged on lanes, zero-padded to
    128-multiples; rows beyond W_in*Cin are zero (matches padded activation lanes)."""
    g = _pooled_conv_weights(w_oihw, W_in, pad)
    _, KH, kin, nout = g.shape
    out = jnp.zeros((KH, k_rows, 2 * lane_pad), jnp.float32)
    out = out.at[:, :kin, :nout].set(g[0])
    out = out.at[:, :kin, lane_pad:lane_pad + nout].set(g[1])
    return out


def _pool_shift_selectors(B, H_in, Hq, KH, pad, h_major_out):
    """(KH, 2*B*Hq, B*H_in) 0/1 matrices folding tap shift + H-padding + 2x2 H-pool.

    For tap dh, row block [0:B*Hq] picks conv row 2i (even H parity) of every image,
    [B*Hq:] picks conv row 2i+1; columns index the batch-stacked unpadded input rows
    (b*H_in + u).  Out-of-range taps (H zero-padding) give all-zero rows, and
    cross-image rows are never selected (block-diagonal in b).
    h_major_out=False -> pooled row b*Hq + i (feeds the next conv layer);
    h_major_out=True  -> pooled row i*B + b (feeds the FC with 8-aligned slices).
    """
    sel = np.zeros((KH, 2, B, Hq, B, H_in), np.float32)
    for dh in range(KH):
        for p in range(2):
            for b in range(B):
                for i in range(Hq):
                    u = 2 * i + p + dh - pad
                    if 0 <= u < H_in:
                        sel[dh, p, b, i, b, u] = 1.0
    if h_major_out:
        sel = sel.transpose(0, 1, 3, 2, 4, 5)     # (KH, 2, Hq, B, B, H_in)
    return jnp.asarray(sel.reshape(KH, 2 * B * Hq, B * H_in))


def _fc_weight_packed(fw, Hq, Wq, Cout, k_rows, nc_pad):
    """Torch fc weight (NC, Cout*Hq*Wq) (NCHW flatten) -> (Hq, k_rows, nc_pad) in the
    packed (w*Cout + c) activation-lane order; padding rows/cols are zero."""
    NC = fw.shape[0]
    w = fw.reshape(NC, Cout, Hq, Wq)              # torch .view() flatten order
    w = jnp.transpose(w, (2, 3, 1, 0)).reshape(Hq, Wq * Cout, NC)
    out = jnp.zeros((Hq, k_rows, nc_pad), jnp.float32)
    return out.at[:, :Wq * Cout, :NC].set(w.astype(jnp.float32))


def _padded_bias_row(b, Wq, lane_pad):
    row = jnp.zeros((1, lane_pad), jnp.float32)
    return row.at[0, :Wq * b.shape[0]].set(jnp.tile(b.astype(jnp.float32), Wq))


# ----------------------------------------------------------------------------
# Fused kernel: conv1+pool+relu -> conv2+pool+relu -> fc, B images per grid step.
# ----------------------------------------------------------------------------
def _conv_pool_relu_stage(x, w_ref, s_ref, b_ref, d: _StageDims):
    """relu(maxpool2x2(conv2d(x) + bias)) on B stacked images, all MXU matmuls.

    x     : (d.rows_in, d.k_in)                 batch-stacked activation rows.
    w_ref : (d.KH, d.k_in, 2*d.lane_pad)        merged even|odd Toeplitz weights.
    s_ref : (d.KH, 2*d.pool_rows, d.rows_in)    0/1 shift+pool row selectors.
    b_ref : (1, d.lane_pad)                     bias tiled over packed (w, cout) lanes.
    Returns (d.pool_rows, d.lane_pad) float32.
    """
    acc = jnp.zeros((2 * d.pool_rows, 2 * d.lane_pad), jnp.float32)
    for dh in range(d.KH):                              # static unroll over taps
        part = jnp.dot(x, w_ref[dh], preferred_element_type=jnp.float32)
        acc = acc + jnp.dot(s_ref[dh], part, preferred_element_type=jnp.float32)
    even_h, odd_h = acc[:d.pool_rows], acc[d.pool_rows:]
    pooled = jnp.maximum(                               # 2x2 max over aligned quadrants
        jnp.maximum(even_h[:, :d.lane_pad], even_h[:, d.lane_pad:]),
        jnp.maximum(odd_h[:, :d.lane_pad], odd_h[:, d.lane_pad:]))
    return jnp.maximum(pooled + b_ref[...], 0.0)        # bias + ReLU


def _default_cnn_kernel(x_ref, w1_ref, s1_ref, b1_ref, w2_ref, s2_ref, b2_ref,
                        wfc_ref, fb_ref, o_ref, *, B, d1, d2, Hq2):
    # conv1 -> maxpool(2) -> relu          (output rows ordered b*Hq1 + i)
    y1 = _conv_pool_relu_stage(x_ref[...], w1_ref, s1_ref, b1_ref, d1)
    # conv2 -> maxpool(2) -> relu          (output rows ordered i*B + b, h-major)
    y2 = _conv_pool_relu_stage(y1, w2_ref, s2_ref, b2_ref, d2)

    # TODO(synk): Dropout2d / F.dropout are identity in eval mode; training-mode RNG
    # dropout is not reproduced here.

    # Fully-connected layer: Hq2 sublane-aligned (B, lane) @ (lane, nc_pad) matmuls.
    acc = jnp.zeros((B, o_ref.shape[1]), jnp.float32)
    for h in range(Hq2):
        acc = acc + jnp.dot(y2[h * B:(h + 1) * B, :], wfc_ref[h],
                            preferred_element_type=jnp.float32)
    o_ref[...] = acc + fb_ref[...]                      # lane-dense (B, 128) store


# ----------------------------------------------------------------------------
# Wrapper: whole forward pass in ONE pallas_call.
# ----------------------------------------------------------------------------
def default_cnn_forward(x_nchw, w1, b1, w2, b2, fw, fb, *, block_b=8):
    """DefaultCNN forward.  block_b images per grid step (multiple of 8; pick 16 on
    v6e/v7x so the conv matmul M dimension approaches 256)."""
    if block_b % 8:
        raise ValueError("block_b must be a multiple of 8")
    N, Cin, H, W = x_nchw.shape
    g1 = _conv_geom(H, W, w1, pad=1)
    g2 = _conv_geom(g1.Hq, g1.Wq, w2, pad=1)
    NC = fw.shape[0]

    lp1 = _round_up(g1.Wq * g1.Cout, _LANE)      # conv1 packed lane width (96 -> 128)
    lp2 = _round_up(g2.Wq * g2.Cout, _LANE)      # conv2 packed lane width (96 -> 128)
    ncp = _round_up(NC, _LANE)                   # logits lane width (4 -> 128)
    B = block_b
    n_pad = _round_up(N, B)
    n_steps = n_pad // B

    # ---- trace-time weight repacking (folds into the compiled graph) ----
    w1m = _merged_conv_weights(w1, g1.W, g1.pad, g1.W * g1.Cin, lp1)
    w2m = _merged_conv_weights(w2, g2.W, g2.pad, lp1, lp2)   # rows zero-padded to lp1
    s1 = _pool_shift_selectors(B, g1.H, g1.Hq, g1.K, g1.pad, h_major_out=False)
    s2 = _pool_shift_selectors(B, g2.H, g2.Hq, g2.K, g2.pad, h_major_out=True)
    b1r = _padded_bias_row(b1, g1.Wq, lp1)
    b2r = _padded_bias_row(b2, g2.Wq, lp2)
    wfc = _fc_weight_packed(fw, g2.Hq, g2.Wq, g2.Cout, lp2, ncp)
    fbr = jnp.zeros((1, ncp), jnp.float32).at[0, :NC].set(fb.astype(jnp.float32))

    # ---- input layout: NCHW -> batch-stacked, channel-fastest rows ----
    x = x_nchw.astype(jnp.float32)
    if n_pad != N:
        x = jnp.pad(x, ((0, n_pad - N), (0, 0), (0, 0), (0, 0)))
    x2d = jnp.transpose(x, (0, 2, 3, 1)).reshape(n_pad * H, W * Cin)

    d1 = _StageDims(g1.K, B * g1.H, g1.W * g1.Cin, B * g1.Hq, lp1)
    d2 = _StageDims(g2.K, B * g2.H, lp1, B * g2.Hq, lp2)

    kernel = functools.partial(_default_cnn_kernel, B=B, d1=d1, d2=d2, Hq2=g2.Hq)
    const2 = lambda n: (0, 0)
    const3 = lambda n: (0, 0, 0)
    # Note: the constant-index weight inputs could be single-buffered
    # (pipeline_mode=pl.Buffered(1)) to save VMEM; total footprint here is <2 MiB so
    # the default double-buffering is kept.  On v7x, pltpu.CORE_PARALLEL on the batch
    # axis would split grid steps across both TensorCores.
    out = pl.pallas_call(
        kernel,
        out_shape=jax.ShapeDtypeStruct((n_pad, ncp), jnp.float32),
        grid=(n_steps,),
        in_specs=[
            pl.BlockSpec((B * H, W * Cin), lambda n: (n, 0)),   # B stacked images
            pl.BlockSpec(w1m.shape, const3),                    # conv1 merged Toeplitz
            pl.BlockSpec(s1.shape, const3),                     # conv1 shift+pool sel
            pl.BlockSpec(b1r.shape, const2),                    # conv1 bias row
            pl.BlockSpec(w2m.shape, const3),                    # conv2 merged Toeplitz
            pl.BlockSpec(s2.shape, const3),                     # conv2 shift+pool sel
            pl.BlockSpec(b2r.shape, const2),                    # conv2 bias row
            pl.BlockSpec(wfc.shape, const3),                    # fc weight (packed)
            pl.BlockSpec(fbr.shape, const2),                    # fc bias row
        ],
        out_specs=pl.BlockSpec((B, ncp), lambda n: (n, 0)),     # lane-dense logits
        compiler_params=pltpu.CompilerParams(
            dimension_semantics=("parallel",)),
    )(x2d, w1m, s1, b1r, w2m, s2, b2r, wfc, fbr)
    return out[:N, :NC]


# ----------------------------------------------------------------------------
# Pure-JAX reference (correctness check only).
# ----------------------------------------------------------------------------
def _ref_forward(x_nchw, w1, b1, w2, b2, fw, fb):
    def conv(x, w, b):
        y = jax.lax.conv_general_dilated(
            x, w, (1, 1), [(1, 1), (1, 1)],
            dimension_numbers=("NCHW", "OIHW", "NCHW"),
            precision=jax.lax.Precision.HIGHEST)
        return y + b[None, :, None, None]

    def pool(x):
        return jax.lax.reduce_window(x, -jnp.inf, jax.lax.max,
                                     (1, 1, 2, 2), (1, 1, 2, 2), "VALID")

    y = jnp.maximum(pool(conv(x_nchw, w1, b1)), 0.0)
    y = jnp.maximum(pool(conv(y, w2, b2)), 0.0)
    y = y.reshape(x_nchw.shape[0], -1)
    return jnp.dot(y, fw.T, precision=jax.lax.Precision.HIGHEST) + fb


if __name__ == "__main__":
    key = jax.random.PRNGKey(0)
    k1, k2, k3, k4, k5, k6, kx = jax.random.split(key, 7)

    N, Cin, H, W = 16, 3, 16, 16          # 16 images -> 2 grid steps of 8
    num_classes = 4

    # Input in PyTorch NCHW layout.
    x = jax.random.normal(kx, (N, Cin, H, W), jnp.float32)

    # Deterministic synthetic parameters (torch layouts).
    w1 = jax.random.normal(k1, (12, 3, 2, 2), jnp.float32) * 0.1    # conv1 weight
    b1 = jax.random.normal(k2, (12,), jnp.float32) * 0.1            # conv1 bias
    w2 = jax.random.normal(k3, (24, 12, 3, 3), jnp.float32) * 0.1   # conv2 weight
    b2 = jax.random.normal(k4, (24,), jnp.float32) * 0.1            # conv2 bias

    # conv/pool shape trace: 16 ->(k2,p1) 17 ->pool 8 ->(k3,p1) 8 ->pool 4
    feature_size = 24 * 4 * 4                                       # 384
    fw = jax.random.normal(k5, (num_classes, feature_size), jnp.float32) * 0.05
    fb = jax.random.normal(k6, (num_classes,), jnp.float32) * 0.05

    fwd = jax.jit(default_cnn_forward)
    out = jax.block_until_ready(fwd(x, w1, b1, w2, b2, fw, fb))
    assert out.shape == (N, num_classes), out.shape

    ref = jax.block_until_ready(_ref_forward(x, w1, b1, w2, b2, fw, fb))
    assert np.allclose(np.asarray(out), np.asarray(ref), rtol=1e-3, atol=1e-3), (
        np.max(np.abs(np.asarray(out) - np.asarray(ref))))

    print("KERNEL_OK")
</pallas_src>

<mosaic_0001>
module attributes {stable_mosaic.version = 11 : i64} {
  func.func @_default_cnn_kernel(%arg0: i32, %arg1: memref<128x48xf32, #tpu.memory_space<vmem>>, %arg2: memref<2x48x256xf32, #tpu.memory_space<vmem>>, %arg3: memref<2x128x128xf32, #tpu.memory_space<vmem>>, %arg4: memref<1x128xf32, #tpu.memory_space<vmem>>, %arg5: memref<3x128x256xf32, #tpu.memory_space<vmem>>, %arg6: memref<3x64x64xf32, #tpu.memory_space<vmem>>, %arg7: memref<1x128xf32, #tpu.memory_space<vmem>>, %arg8: memref<4x128x128xf32, #tpu.memory_space<vmem>>, %arg9: memref<1x128xf32, #tpu.memory_space<vmem>>, %arg10: memref<8x128xf32, #tpu.memory_space<vmem>>) attributes {dimension_semantics = [#tpu.dimension_semantics<parallel>], iteration_bounds = array<i64: 2>, scalar_prefetch = 0 : i64, scratch_operands = 0 : i64, tpu.core_type = #tpu.core_type<tc>, window_params = [{transform_indices = @transform_0, window_bounds = array<i64: 128, 48>}, {pipeline_mode = #tpu.pipeline_mode<synchronous>, transform_indices = @transform_1, window_bounds = array<i64: 2, 48, 256>}, {pipeline_mode = #tpu.pipeline_mode<synchronous>, transform_indices = @transform_2, window_bounds = array<i64: 2, 128, 128>}, {pipeline_mode = #tpu.pipeline_mode<synchronous>, transform_indices = @transform_3, window_bounds = array<i64: 1, 128>}, {pipeline_mode = #tpu.pipeline_mode<synchronous>, transform_indices = @transform_4, window_bounds = array<i64: 3, 128, 256>}, {pipeline_mode = #tpu.pipeline_mode<synchronous>, transform_indices = @transform_5, window_bounds = array<i64: 3, 64, 64>}, {pipeline_mode = #tpu.pipeline_mode<synchronous>, transform_indices = @transform_6, window_bounds = array<i64: 1, 128>}, {pipeline_mode = #tpu.pipeline_mode<synchronous>, transform_indices = @transform_7, window_bounds = array<i64: 4, 128, 128>}, {pipeline_mode = #tpu.pipeline_mode<synchronous>, transform_indices = @transform_8, window_bounds = array<i64: 1, 128>}, {transform_indices = @transform_9, window_bounds = array<i64: 8, 128>}]} {
    %c0 = arith.constant 0 : index
    %c0_0 = arith.constant 0 : index
    %0 = vector.load %arg1[%c0, %c0_0] : memref<128x48xf32, #tpu.memory_space<vmem>>, vector<128x48xf32>
    %cst = arith.constant 0.000000e+00 : f32
    %1 = vector.broadcast %cst : f32 to vector<128x256xf32>
    %c0_1 = arith.constant 0 : index
    %c0_2 = arith.constant 0 : index
    %c0_3 = arith.constant 0 : index
    %2 = vector.load %arg2[%c0_1, %c0_2, %c0_3] : memref<2x48x256xf32, #tpu.memory_space<vmem>>, vector<1x48x256xf32>
    %3 = vector.shape_cast %2 : vector<1x48x256xf32> to vector<48x256xf32>
    %cst_4 = arith.constant dense<0.000000e+00> : vector<128x256xf32>
    %4 = tpu.matmul %0, %3, %cst_4 {dimension_numbers = #tpu.dot_dimension_numbers<[1], [0], [0], [1], [0, 0, 1, 1], [], []>} : vector<128x48xf32>, vector<48x256xf32>, vector<128x256xf32> -> vector<128x256xf32>
    %c0_5 = arith.constant 0 : index
    %c0_6 = arith.constant 0 : index
    %c0_7 = arith.constant 0 : index
    %5 = vector.load %arg3[%c0_5, %c0_6, %c0_7] : memref<2x128x128xf32, #tpu.memory_space<vmem>>, vector<1x128x128xf32>
    %6 = vector.shape_cast %5 : vector<1x128x128xf32> to vector<128x128xf32>
    %cst_8 = arith.constant dense<0.000000e+00> : vector<128x256xf32>
    %7 = tpu.matmul %6, %4, %cst_8 {dimension_numbers = #tpu.dot_dimension_numbers<[1], [0], [0], [1], [0, 0, 1, 1], [], []>} : vector<128x128xf32>, vector<128x256xf32>, vector<128x256xf32> -> vector<128x256xf32>
    %8 = arith.addf %1, %7 : vector<128x256xf32>
    %c1 = arith.constant 1 : index
    %c0_9 = arith.constant 0 : index
    %c0_10 = arith.constant 0 : index
    %9 = vector.load %arg2[%c1, %c0_9, %c0_10] : memref<2x48x256xf32, #tpu.memory_space<vmem>>, vector<1x48x256xf32>
    %10 = vector.shape_cast %9 : vector<1x48x256xf32> to vector<48x256xf32>
    %cst_11 = arith.constant dense<0.000000e+00> : vector<128x256xf32>
    %11 = tpu.matmul %0, %10, %cst_11 {dimension_numbers = #tpu.dot_dimension_numbers<[1], [0], [0], [1], [0, 0, 1, 1], [], []>} : vector<128x48xf32>, vector<48x256xf32>, vector<128x256xf32> -> vector<128x256xf32>
    %c1_12 = arith.constant 1 : index
    %c0_13 = arith.constant 0 : index
    %c0_14 = arith.constant 0 : index
    %12 = vector.load %arg3[%c1_12, %c0_13, %c0_14] : memref<2x128x128xf32, #tpu.memory_space<vmem>>, vector<1x128x128xf32>
    %13 = vector.shape_cast %12 : vector<1x128x128xf32> to vector<128x128xf32>
    %cst_15 = arith.constant dense<0.000000e+00> : vector<128x256xf32>
    %14 = tpu.matmul %13, %11, %cst_15 {dimension_numbers = #tpu.dot_dimension_numbers<[1], [0], [0], [1], [0, 0, 1, 1], [], []>} : vector<128x128xf32>, vector<128x256xf32>, vector<128x256xf32> -> vector<128x256xf32>
    %15 = arith.addf %8, %14 : vector<128x256xf32>
    %16 = vector.extract_strided_slice %15 {offsets = [0, 0], sizes = [64, 256], strides = [1, 1]} : vector<128x256xf32> to vector<64x256xf32>
    %17 = vector.extract_strided_slice %15 {offsets = [64, 0], sizes = [64, 256], strides = [1, 1]} : vector<128x256xf32> to vector<64x256xf32>
    %18 = vector.extract_strided_slice %16 {offsets = [0, 0], sizes = [64, 128], strides = [1, 1]} : vector<64x256xf32> to vector<64x128xf32>
    %19 = vector.extract_strided_slice %16 {offsets = [0, 128], sizes = [64, 128], strides = [1, 1]} : vector<64x256xf32> to vector<64x128xf32>
    %20 = arith.maximumf %18, %19 : vector<64x128xf32>
    %21 = vector.extract_strided_slice %17 {offsets = [0, 0], sizes = [64, 128], strides = [1, 1]} : vector<64x256xf32> to vector<64x128xf32>
    %22 = vector.extract_strided_slice %17 {offsets = [0, 128], sizes = [64, 128], strides = [1, 1]} : vector<64x256xf32> to vector<64x128xf32>
    %23 = arith.maximumf %21, %22 : vector<64x128xf32>
    %24 = arith.maximumf %20, %23 : vector<64x128xf32>
    %c0_16 = arith.constant 0 : index
    %c0_17 = arith.constant 0 : index
    %25 = vector.load %arg4[%c0_16, %c0_17] : memref<1x128xf32, #tpu.memory_space<vmem>>, vector<1x128xf32>
    %26 = vector.broadcast %25 : vector<1x128xf32> to vector<64x128xf32>
    %27 = arith.addf %24, %26 : vector<64x128xf32>
    %cst_18 = arith.constant 0.000000e+00 : f32
    %28 = vector.broadcast %cst_18 : f32 to vector<64x128xf32>
    %29 = arith.maximumf %27, %28 : vector<64x128xf32>
    %cst_19 = arith.constant 0.000000e+00 : f32
    %30 = vector.broadcast %cst_19 : f32 to vector<64x256xf32>
    %c0_20 = arith.constant 0 : index
    %c0_21 = arith.constant 0 : index
    %c0_22 = arith.constant 0 : index
    %31 = vector.load %arg5[%c0_20, %c0_21, %c0_22] : memref<3x128x256xf32, #tpu.memory_space<vmem>>, vector<1x128x256xf32>
    %32 = vector.shape_cast %31 : vector<1x128x256xf32> to vector<128x256xf32>
    %cst_23 = arith.constant dense<0.000000e+00> : vector<64x256xf32>
    %33 = tpu.matmul %29, %32, %cst_23 {dimension_numbers = #tpu.dot_dimension_numbers<[1], [0], [0], [1], [0, 0, 1, 1], [], []>} : vector<64x128xf32>, vector<128x256xf32>, vector<64x256xf32> -> vector<64x256xf32>
    %c0_24 = arith.constant 0 : index
    %c0_25 = arith.constant 0 : index
    %c0_26 = arith.constant 0 : index
    %34 = vector.load %arg6[%c0_24, %c0_25, %c0_26] : memref<3x64x64xf32, #tpu.memory_space<vmem>>, vector<1x64x64xf32>
    %35 = vector.shape_cast %34 : vector<1x64x64xf32> to vector<64x64xf32>
    %cst_27 = arith.constant dense<0.000000e+00> : vector<64x256xf32>
    %36 = tpu.matmul %35, %33, %cst_27 {dimension_numbers = #tpu.dot_dimension_numbers<[1], [0], [0], [1], [0, 0, 1, 1], [], []>} : vector<64x64xf32>, vector<64x256xf32>, vector<64x256xf32> -> vector<64x256xf32>
    %37 = arith.addf %30, %36 : vector<64x256xf32>
    %c1_28 = arith.constant 1 : index
    %c0_29 = arith.constant 0 : index
    %c0_30 = arith.constant 0 : index
    %38 = vector.load %arg5[%c1_28, %c0_29, %c0_30] : memref<3x128x256xf32, #tpu.memory_space<vmem>>, vector<1x128x256xf32>
    %39 = vector.shape_cast %38 : vector<1x128x256xf32> to vector<128x256xf32>
    %cst_31 = arith.constant dense<0.000000e+00> : vector<64x256xf32>
    %40 = tpu.matmul %29, %39, %cst_31 {dimension_numbers = #tpu.dot_dimension_numbers<[1], [0], [0], [1], [0, 0, 1, 1], [], []>} : vector<64x128xf32>, vector<128x256xf32>, vector<64x256xf32> -> vector<64x256xf32>
    %c1_32 = arith.constant 1 : index
    %c0_33 = arith.constant 0 : index
    %c0_34 = arith.constant 0 : index
    %41 = vector.load %arg6[%c1_32, %c0_33, %c0_34] : memref<3x64x64xf32, #tpu.memory_space<vmem>>, vector<1x64x64xf32>
    %42 = vector.shape_cast %41 : vector<1x64x64xf32> to vector<64x64xf32>
    %cst_35 = arith.constant dense<0.000000e+00> : vector<64x256xf32>
    %43 = tpu.matmul %42, %40, %cst_35 {dimension_numbers = #tpu.dot_dimension_numbers<[1], [0], [0], [1], [0, 0, 1, 1], [], []>} : vector<64x64xf32>, vector<64x256xf32>, vector<64x256xf32> -> vector<64x256xf32>
    %44 = arith.addf %37, %43 : vector<64x256xf32>
    %c2 = arith.constant 2 : index
    %c0_36 = arith.constant 0 : index
    %c0_37 = arith.constant 0 : index
    %45 = vector.load %arg5[%c2, %c0_36, %c0_37] : memref<3x128x256xf32, #tpu.memory_space<vmem>>, vector<1x128x256xf32>
    %46 = vector.shape_cast %45 : vector<1x128x256xf32> to vector<128x256xf32>
    %cst_38 = arith.constant dense<0.000000e+00> : vector<64x256xf32>
    %47 = tpu.matmul %29, %46, %cst_38 {dimension_numbers = #tpu.dot_dimension_numbers<[1], [0], [0], [1], [0, 0, 1, 1], [], []>} : vector<64x128xf32>, vector<128x256xf32>, vector<64x256xf32> -> vector<64x256xf32>
    %c2_39 = arith.constant 2 : index
    %c0_40 = arith.constant 0 : index
    %c0_41 = arith.constant 0 : index
    %48 = vector.load %arg6[%c2_39, %c0_40, %c0_41] : memref<3x64x64xf32, #tpu.memory_space<vmem>>, vector<1x64x64xf32>
    %49 = vector.shape_cast %48 : vector<1x64x64xf32> to vector<64x64xf32>
    %cst_42 = arith.constant dense<0.000000e+00> : vector<64x256xf32>
    %50 = tpu.matmul %49, %47, %cst_42 {dimension_numbers = #tpu.dot_dimension_numbers<[1], [0], [0], [1], [0, 0, 1, 1], [], []>} : vector<64x64xf32>, vector<64x256xf32>, vector<64x256xf32> -> vector<64x256xf32>
    %51 = arith.addf %44, %50 : vector<64x256xf32>
    %52 = vector.extract_strided_slice %51 {offsets = [0, 0], sizes = [32, 256], strides = [1, 1]} : vector<64x256xf32> to vector<32x256xf32>
    %53 = vector.extract_strided_slice %51 {offsets = [32, 0], sizes = [32, 256], strides = [1, 1]} : vector<64x256xf32> to vector<32x256xf32>
    %54 = vector.extract_strided_slice %52 {offsets = [0, 0], sizes = [32, 128], strides = [1, 1]} : vector<32x256xf32> to vector<32x128xf32>
    %55 = vector.extract_strided_slice %52 {offsets = [0, 128], sizes = [32, 128], strides = [1, 1]} : vector<32x256xf32> to vector<32x128xf32>
    %56 = arith.maximumf %54, %55 : vector<32x128xf32>
    %57 = vector.extract_strided_slice %53 {offsets = [0, 0], sizes = [32, 128], strides = [1, 1]} : vector<32x256xf32> to vector<32x128xf32>
    %58 = vector.extract_strided_slice %53 {offsets = [0, 128], sizes = [32, 128], strides = [1, 1]} : vector<32x256xf32> to vector<32x128xf32>
    %59 = arith.maximumf %57, %58 : vector<32x128xf32>
    %60 = arith.maximumf %56, %59 : vector<32x128xf32>
    %c0_43 = arith.constant 0 : index
    %c0_44 = arith.constant 0 : index
    %61 = vector.load %arg7[%c0_43, %c0_44] : memref<1x128xf32, #tpu.memory_space<vmem>>, vector<1x128xf32>
    %62 = vector.broadcast %61 : vector<1x128xf32> to vector<32x128xf32>
    %63 = arith.addf %60, %62 : vector<32x128xf32>
    %cst_45 = arith.constant 0.000000e+00 : f32
    %64 = vector.broadcast %cst_45 : f32 to vector<32x128xf32>
    %65 = arith.maximumf %63, %64 : vector<32x128xf32>
    %cst_46 = arith.constant 0.000000e+00 : f32
    %66 = vector.broadcast %cst_46 : f32 to vector<8x128xf32>
    %67 = vector.extract_strided_slice %65 {offsets = [0, 0], sizes = [8, 128], strides = [1, 1]} : vector<32x128xf32> to vector<8x128xf32>
    %c0_47 = arith.constant 0 : index
    %c0_48 = arith.constant 0 : index
    %c0_49 = arith.constant 0 : index
    %68 = vector.load %arg8[%c0_47, %c0_48, %c0_49] : memref<4x128x128xf32, #tpu.memory_space<vmem>>, vector<1x128x128xf32>
    %69 = vector.shape_cast %68 : vector<1x128x128xf32> to vector<128x128xf32>
    %cst_50 = arith.constant dense<0.000000e+00> : vector<8x128xf32>
    %70 = tpu.matmul %67, %69, %cst_50 {dimension_numbers = #tpu.dot_dimension_numbers<[1], [0], [0], [1], [0, 0, 1, 1], [], []>} : vector<8x128xf32>, vector<128x128xf32>, vector<8x128xf32> -> vector<8x128xf32>
    %71 = arith.addf %66, %70 : vector<8x128xf32>
    %72 = vector.extract_strided_slice %65 {offsets = [8, 0], sizes = [8, 128], strides = [1, 1]} : vector<32x128xf32> to vector<8x128xf32>
    %c1_51 = arith.constant 1 : index
    %c0_52 = arith.constant 0 : index
    %c0_53 = arith.constant 0 : index
    %73 = vector.load %arg8[%c1_51, %c0_52, %c0_53] : memref<4x128x128xf32, #tpu.memory_space<vmem>>, vector<1x128x128xf32>
    %74 = vector.shape_cast %73 : vector<1x128x128xf32> to vector<128x128xf32>
    %cst_54 = arith.constant dense<0.000000e+00> : vector<8x128xf32>
    %75 = tpu.matmul %72, %74, %cst_54 {dimension_numbers = #tpu.dot_dimension_numbers<[1], [0], [0], [1], [0, 0, 1, 1], [], []>} : vector<8x128xf32>, vector<128x128xf32>, vector<8x128xf32> -> vector<8x128xf32>
    %76 = arith.addf %71, %75 : vector<8x128xf32>
    %77 = vector.extract_strided_slice %65 {offsets = [16, 0], sizes = [8, 128], strides = [1, 1]} : vector<32x128xf32> to vector<8x128xf32>
    %c2_55 = arith.constant 2 : index
    %c0_56 = arith.constant 0 : index
    %c0_57 = arith.constant 0 : index
    %78 = vector.load %arg8[%c2_55, %c0_56, %c0_57] : memref<4x128x128xf32, #tpu.memory_space<vmem>>, vector<1x128x128xf32>
    %79 = vector.shape_cast %78 : vector<1x128x128xf32> to vector<128x128xf32>
    %cst_58 = arith.constant dense<0.000000e+00> : vector<8x128xf32>
    %80 = tpu.matmul %77, %79, %cst_58 {dimension_numbers = #tpu.dot_dimension_numbers<[1], [0], [0], [1], [0, 0, 1, 1], [], []>} : vector<8x128xf32>, vector<128x128xf32>, vector<8x128xf32> -> vector<8x128xf32>
    %81 = arith.addf %76, %80 : vector<8x128xf32>
    %82 = vector.extract_strided_slice %65 {offsets = [24, 0], sizes = [8, 128], strides = [1, 1]} : vector<32x128xf32> to vector<8x128xf32>
    %c3 = arith.constant 3 : index
    %c0_59 = arith.constant 0 : index
    %c0_60 = arith.constant 0 : index
    %83 = vector.load %arg8[%c3, %c0_59, %c0_60] : memref<4x128x128xf32, #tpu.memory_space<vmem>>, vector<1x128x128xf32>
    %84 = vector.shape_cast %83 : vector<1x128x128xf32> to vector<128x128xf32>
    %cst_61 = arith.constant dense<0.000000e+00> : vector<8x128xf32>
    %85 = tpu.matmul %82, %84, %cst_61 {dimension_numbers = #tpu.dot_dimension_numbers<[1], [0], [0], [1], [0, 0, 1, 1], [], []>} : vector<8x128xf32>, vector<128x128xf32>, vector<8x128xf32> -> vector<8x128xf32>
    %86 = arith.addf %81, %85 : vector<8x128xf32>
    %c0_62 = arith.constant 0 : index
    %c0_63 = arith.constant 0 : index
    %87 = vector.load %arg9[%c0_62, %c0_63] : memref<1x128xf32, #tpu.memory_space<vmem>>, vector<1x128xf32>
    %88 = vector.broadcast %87 : vector<1x128xf32> to vector<8x128xf32>
    %89 = arith.addf %86, %88 : vector<8x128xf32>
    %c0_64 = arith.constant 0 : index
    %c0_65 = arith.constant 0 : index
    %90 = vector.load %arg10[%c0_64, %c0_65] : memref<8x128xf32, #tpu.memory_space<vmem>>, vector<8x128xf32>
    tpu.vector_store %arg10[%c0_64, %c0_65], %89 {strides = array<i32>} : memref<8x128xf32, #tpu.memory_space<vmem>>, vector<8x128xf32>,
    return
  }
  func.func @transform_0(%arg0: i32) -> (i32, i32) {
    %c0_i32 = arith.constant 0 : i32
    %c0_i32_0 = arith.constant 0 : i32
    return %arg0, %c0_i32 : i32, i32
  }
  func.func @transform_1(%arg0: i32) -> (i32, i32, i32) {
    %c0_i32 = arith.constant 0 : i32
    %c0_i32_0 = arith.constant 0 : i32
    %c0_i32_1 = arith.constant 0 : i32
    %c0_i32_2 = arith.constant 0 : i32
    return %c0_i32, %c0_i32_0, %c0_i32_1 : i32, i32, i32
  }
  func.func @transform_2(%arg0: i32) -> (i32, i32, i32) {
    %c0_i32 = arith.constant 0 : i32
    %c0_i32_0 = arith.constant 0 : i32
    %c0_i32_1 = arith.constant 0 : i32
    %c0_i32_2 = arith.constant 0 : i32
    return %c0_i32, %c0_i32_0, %c0_i32_1 : i32, i32, i32
  }
  func.func @transform_3(%arg0: i32) -> (i32, i32) {
    %c0_i32 = arith.constant 0 : i32
    %c0_i32_0 = arith.constant 0 : i32
    %c0_i32_1 = arith.constant 0 : i32
    return %c0_i32, %c0_i32_0 : i32, i32
  }
  func.func @transform_4(%arg0: i32) -> (i32, i32, i32) {
    %c0_i32 = arith.constant 0 : i32
    %c0_i32_0 = arith.constant 0 : i32
    %c0_i32_1 = arith.constant 0 : i32
    %c0_i32_2 = arith.constant 0 : i32
    return %c0_i32, %c0_i32_0, %c0_i32_1 : i32, i32, i32
  }
  func.func @transform_5(%arg0: i32) -> (i32, i32, i32) {
    %c0_i32 = arith.constant 0 : i32
    %c0_i32_0 = arith.constant 0 : i32
    %c0_i32_1 = arith.constant 0 : i32
    %c0_i32_2 = arith.constant 0 : i32
    return %c0_i32, %c0_i32_0, %c0_i32_1 : i32, i32, i32
  }
  func.func @transform_6(%arg0: i32) -> (i32, i32) {
    %c0_i32 = arith.constant 0 : i32
    %c0_i32_0 = arith.constant 0 : i32
    %c0_i32_1 = arith.constant 0 : i32
    return %c0_i32, %c0_i32_0 : i32, i32
  }
  func.func @transform_7(%arg0: i32) -> (i32, i32, i32) {
    %c0_i32 = arith.constant 0 : i32
    %c0_i32_0 = arith.constant 0 : i32
    %c0_i32_1 = arith.constant 0 : i32
    %c0_i32_2 = arith.constant 0 : i32
    return %c0_i32, %c0_i32_0, %c0_i32_1 : i32, i32, i32
  }
  func.func @transform_8(%arg0: i32) -> (i32, i32) {
    %c0_i32 = arith.constant 0 : i32
    %c0_i32_0 = arith.constant 0 : i32
    %c0_i32_1 = arith.constant 0 : i32
    return %c0_i32, %c0_i32_0 : i32, i32
  }
  func.func @transform_9(%arg0: i32) -> (i32, i32) {
    %c0_i32 = arith.constant 0 : i32
    %c0_i32_0 = arith.constant 0 : i32
    return %arg0, %c0_i32 : i32, i32
  }
}

</mosaic_0001>

<bundles_post_ra>
// kernel: default_cnn_forward.1
= control target key start
LH: loop header
LB: loop body
LE: loop exit
PB: predicated region body
PF: predicated region fallthrough
CT: control target
= control target key end

     0   :  { %s3373_s30 = smov 0   ;;  %s4704_s0 = inlined_call_operand.vmem [shape: f32[256,48], index: 0, kind: input, shape index: {}]   ;;  %s4705_s1 = inlined_call_operand.vmem [shape: f32[2,48,256], index: 1, kind: input, shape index: {}]   ;;  %s4706_s2 = inlined_call_operand.vmem [shape: f32[2,128,128], index: 2, kind: input, shape index: {}]   ;;  %s4707_s3 = inlined_call_operand.vmem [shape: f32[1,128], index: 3, kind: input, shape index: {}]   ;;  %s4708_s4 = inlined_call_operand.vmem [shape: f32[3,128,256], index: 4, kind: input, shape index: {}]   ;;  %s4709_s5 = inlined_call_operand.vmem [shape: f32[3,64,64], index: 5, kind: input, shape index: {}]   ;;  %s4710_s6 = inlined_call_operand.vmem [shape: f32[1,128], index: 6, kind: input, shape index: {}]   ;;  %s4711_s7 = inlined_call_operand.vmem [shape: f32[4,128,128], index: 7, kind: input, shape index: {}]   ;;  %s4712_s8 = inlined_call_operand.vmem [shape: f32[1,128], index: 8, kind: input, shape index: {}]   ;;  %s4713_s9 = inlined_call_operand.vmem [shape: f32[16,128], index: 9, kind: output, shape index: {}]  }
   0x1 LB: > { %s3379_s10 = sadd.s32 4294967295, %s3318_s30   ;;  %p2480_p0 = scmp.ge.s32.totalorder %s3318_s30, 1  ;;  %s3318_s30 = sphi %s3373_s30, %s19_s30  }
   0x2   : > { %p288_p1 = scmp.lt.s32.totalorder %s3318_s30, 3 }
   0x4   : > { %p289_p2 = pnand %p2480_p0, %p288_p1 }
   0x5   : > { %v2501_v0 = vld [vmem:[%s4705_s1 + $0x68] sm:$0xff] (!%p289_p2)  ;;  %v2503_v1 = vld [vmem:[%s4705_s1 + $0x78] sm:$0xff] (!%p289_p2)  ;;  %v2500_v2 = vld [vmem:[%s4705_s1 + $0x60] sm:$0xff] (!%p289_p2)  ;;  %s2481_s17 = sshll.u32 (!%p289_p2), %s3379_s10, 4  ;;  %v3320_v7 = vmov (!%p289_p2), 0.0   ;;  %vm361_vm0 = vcmask (!%p289_p2), 392192  }
   0x6   : > { %292 = sbr.rel (%p289_p2) target bundleno = 1451 (0x5ab), region = 56  ;;  %v2921_v3 = vpack.c.bf16 (!%p289_p2), %v2503_v1, %v2501_v0  ;;  %v2502_v4 = vld [vmem:[%s4705_s1 + $0x70] sm:$0xff] (!%p289_p2)  ;;  %v2505_v5 = vld [vmem:[%s4705_s1 + $0x88] sm:$0xff] (!%p289_p2)  ;;  %v2507_v6 = vld [vmem:[%s4705_s1 + $0x98] sm:$0xff] (!%p289_p2)  ;;  %664 = vmatprep.mubr.f32.mxu1 (!%p289_p2), %v3320_v7  ;;  %p324_p3 = scmp.lt.s32.totalorder (!%p289_p2), %s2481_s17, 31  ;;  %474 = vmatprep.mubr.f32.mxu0 (!%p289_p2), %v3320_v7  ;;  %vm1455_vm1 = vcmask (!%p289_p2), 523264  }
   0x7   : > { %v2923_v8 = vpack.c.bf16 (!%p289_p2), %v2502_v4, %v2500_v2  ;;  %v2925_v9 = vpack.c.bf16 (!%p289_p2), %v2507_v6, %v2505_v5  ;;  %v2504_v10 = vld [vmem:[%s4705_s1 + $0x80] sm:$0xff] (!%p289_p2)  ;;  %v2506_v11 = vld [vmem:[%s4705_s1 + $0x90] sm:$0xff] (!%p289_p2)  ;;  %v2509_v12 = vld [vmem:[%s4705_s1 + $0xa8] sm:$0xff] (!%p289_p2)  ;;  %vm3322_vm2 = vmmov (!%p289_p2), 0   ;;  %p329_p4 = scmp.lt.s32.totalorder (!%p289_p2), %s3379_s10, 1 }
   0x8   : > { %2922 = vmatprep.subr.bf16.mxu1 (!%p289_p2), %v2921_v3  ;;  %v2511_v13 = vld [vmem:[%s4705_s1 + $0xb8] sm:$0xff] (!%p289_p2)  ;;  %v2508_v14 = vld [vmem:[%s4705_s1 + $0xa0] sm:$0xff] (!%p289_p2)  ;;  %v2510_v15 = vld [vmem:[%s4705_s1 + $0xb0] sm:$0xff] (!%p289_p2)  ;;  %v2927_v16 = vpack.c.bf16 (!%p289_p2), %v2506_v11, %v2504_v10 }
   0x9   : > { %2924 = vmatpush1.bf16.msra.mxu1 (!%p289_p2), %v2923_v8  ;;  %v350_v17 = vld [vmem:[%s4705_s1 + $0x8] sm:$0xff] (!%p289_p2)  ;;  %v352_v18 = vld [vmem:[%s4705_s1 + $0x18] sm:$0xff] (!%p289_p2)  ;;  %v349_v19 = vld [vmem:[%s4705_s1] sm:$0xff] (!%p289_p2)  ;;  %v2929_v20 = vpack.c.bf16 (!%p289_p2), %v2511_v13, %v2509_v12  ;;  %v2931_v29 = vpack.c.bf16 (!%p289_p2), %v2510_v15, %v2508_v14 }
   0xa   : > { %2926 = vmatprep.subr.bf16.mxu1 (!%p289_p2), %v2925_v9  ;;  %v2909_v21 = vpack.c.bf16 (!%p289_p2), %v352_v18, %v350_v17  ;;  %v351_v22 = vld [vmem:[%s4705_s1 + $0x10] sm:$0xff] (!%p289_p2)  ;;  %v354_v23 = vld [vmem:[%s4705_s1 + $0x28] sm:$0xff] (!%p289_p2)  ;;  %v356_v24 = vld [vmem:[%s4705_s1 + $0x38] sm:$0xff] (!%p289_p2) }
   0xb   : > { %v2911_v25 = vpack.c.bf16 (!%p289_p2), %v351_v22, %v349_v19  ;;  %v2913_v26 = vpack.c.bf16 (!%p289_p2), %v356_v24, %v354_v23  ;;  %v353_v27 = vld [vmem:[%s4705_s1 + $0x20] sm:$0xff] (!%p289_p2)  ;;  %v355_v28 = vld [vmem:[%s4705_s1 + $0x30] sm:$0xff] (!%p289_p2)  ;;  %v358_v31 = vld [vmem:[%s4705_s1 + $0x48] sm:$0xff] (!%p289_p2) }
   0xc   : > { %2910 = vmatprep.subr.bf16.mxu0 (!%p289_p2), %v2909_v21  ;;  %v2915_v30 = vpack.c.bf16 (!%p289_p2), %v355_v28, %v353_v27  ;;  %v360_v32 = vld [vmem:[%s4705_s1 + $0x58] sm:$0xff] (!%p289_p2)  ;;  %v357_v35 = vld [vmem:[%s4705_s1 + $0x40] sm:$0xff] (!%p289_p2)  ;;  %v359_v36 = vld [vmem:[%s4705_s1 + $0x50] sm:$0xff] (!%p289_p2) }
   0xd   : > { %s4719_s17 = smov (!%p324_p3, %s2481_s17), 31  ;;  %2928 = vmatpush1.bf16.msra.mxu1 %v2927_v16  ;;  %2912 = vmatpush1.bf16.msra.mxu0 %v2911_v25  ;;  %v2917_v34 = vpack.c.bf16 %v360_v32, %v358_v31  ;;  %v2919_v37 = vpack.c.bf16 %v359_v36, %v357_v35  ;;  %s4721_s10 = smov (!%p329_p4, %s3379_s10), 1 }
   0xe   : > { %s2482_s11 = sshll.u32 %s4719_s17, 3  ;;  %2930 = vmatprep.subr.bf16.mxu1 %v2929_v20  ;;  %2914 = vmatprep.subr.bf16.mxu0 %v2913_v26  ;;  %s2483_s26 = sshll.u32 %s4721_s10, 3 }
   0xf   : > { %s3449_s17 = scalar_lea.vmem %s4704_s0, %s2482_s11  ;;  %s332_s12 = scalar_lea.vmem %s4713_s9, %s2483_s26 }
  0x10   : > { %v333_v33 = vld [vmem:[%s3449_s17] sm:$0xff]  ;;  %v334_v38 = vld [vmem:[%s3449_s17 + $0x8] sm:$0xff]  ;;  %v335_v39 = vld [vmem:[%s3449_s17 + $0x10] sm:$0xff] }
  0x11   : > { %2932 = vmatpush1.bf16.msra.mxu1 %v2931_v29  ;;  %2916 = vmatpush1.bf16.msra.mxu0 %v2915_v30  ;;  %v336_v40 = vld [vmem:[%s3449_s17 + $0x18] sm:$0xff]  ;;  %v337_v41 = vld [vmem:[%s3449_s17 + $0x20] sm:$0xff]  ;;  %v338_v42 = vld [vmem:[%s3449_s17 + $0x28] sm:$0xff] }
  0x12   : > { %2918 = vmatprep.subr.bf16.mxu0 %v2917_v34  ;;  %v339_v43 = vld [vmem:[%s3449_s17 + $0x30] sm:$0xff]  ;;  %v340_v44 = vld [vmem:[%s3449_s17 + $0x38] sm:$0xff]  ;;  %v341_v45 = vld [vmem:[%s3449_s17 + $0x40] sm:$0xff] }
  0x13   : > { %v342_v46 = vld [vmem:[%s3449_s17 + $0x48] sm:$0xff]  ;;  %v343_v47 = vld [vmem:[%s3449_s17 + $0x50] sm:$0xff]  ;;  %v344_v48 = vld [vmem:[%s3449_s17 + $0x58] sm:$0xff] }
  0x14   : > { %2512 = vmatmul.mubr.msk.f32.vlgmr.msra.gmra.mrb[0].mxu1 %vm361_vm0, %v333_v33  ;;  %v345_v49 = vld [vmem:[%s3449_s17 + $0x60] sm:$0xff]  ;;  %v346_v50 = vld [vmem:[%s3449_s17 + $0x68] sm:$0xff]  ;;  %v347_v51 = vld [vmem:[%s3449_s17 + $0x70] sm:$0xff] }
  0x15   : > { %670 = vmatprep.mubr.f32.mxu1 %v3320_v7  ;;  %2920 = vmatpush1.bf16.msra.mxu0 %v2919_v37  ;;  %v348_v52 = vld [vmem:[%s3449_s17 + $0x78] sm:$0xff] }
  0x18   : > { %2513 = vmatmul.mubr.msk.f32.gmra.mrb[2].mxu1 %vm361_vm0, %v334_v38  ;;  %2484 = vmatmul.mubr.msk.f32.vlgmr.msra.gmra.mrb[0].mxu0 %vm361_vm0, %v333_v33 }
  0x19   : > { %676 = vmatprep.mubr.f32.mxu1 %v3320_v7  ;;  %480 = vmatprep.mubr.f32.mxu0 %v3320_v7 }
  0x1c   : > { %2514 = vmatmul.mubr.msk.f32.gmra.mrb[4].mxu1 %vm361_vm0, %v335_v39  ;;  %2485 = vmatmul.mubr.msk.f32.gmra.mrb[2].mxu0 %vm361_vm0, %v334_v38 }
  0x1d   : > { %682 = vmatprep.mubr.f32.mxu1 %v3320_v7  ;;  %486 = vmatprep.mubr.f32.mxu0 %v3320_v7 }
  0x20   : > { %2515 = vmatmul.mubr.msk.f32.gmra.mrb[6].mxu1 %vm361_vm0, %v336_v40  ;;  %2486 = vmatmul.mubr.msk.f32.gmra.mrb[4].mxu0 %vm361_vm0, %v335_v39 }
  0x21   : > { %688 = vmatprep.mubr.f32.mxu1 %v3320_v7  ;;  %492 = vmatprep.mubr.f32.mxu0 %v3320_v7 }
  0x24   : > { %2516 = vmatmul.mubr.msk.f32.gmra.mrb[8].mxu1 %vm361_vm0, %v337_v41  ;;  %2487 = vmatmul.mubr.msk.f32.gmra.mrb[6].mxu0 %vm361_vm0, %v336_v40 }
  0x25   : > { %694 = vmatprep.mubr.f32.mxu1 %v3320_v7  ;;  %498 = vmatprep.mubr.f32.mxu0 %v3320_v7 }
  0x28   : > { %2517 = vmatmul.mubr.msk.f32.gmra.mrb[10].mxu1 %vm361_vm0, %v338_v42  ;;  %2488 = vmatmul.mubr.msk.f32.gmra.mrb[8].mxu0 %vm361_vm0, %v337_v41 }
  0x29   : > { %700 = vmatprep.mubr.f32.mxu1 %v3320_v7  ;;  %504 = vmatprep.mubr.f32.mxu0 %v3320_v7 }
  0x2c   : > { %2518 = vmatmul.mubr.msk.f32.gmra.mrb[12].mxu1 %vm361_vm0, %v339_v43  ;;  %2489 = vmatmul.mubr.msk.f32.gmra.mrb[10].mxu0 %vm361_vm0, %v338_v42 }
  0x2d   : > { %706 = vmatprep.mubr.f32.mxu1 %v3320_v7  ;;  %510 = vmatprep.mubr.f32.mxu0 %v3320_v7 }
  0x30   : > { %2519 = vmatmul.mubr.msk.f32.gmra.mrb[14].mxu1 %vm361_vm0, %v340_v44  ;;  %2490 = vmatmul.mubr.msk.f32.gmra.mrb[12].mxu0 %vm361_vm0, %v339_v43 }
  0x31   : > { %712 = vmatprep.mubr.f32.mxu1 %v3320_v7  ;;  %516 = vmatprep.mubr.f32.mxu0 %v3320_v7 }
  0x34   : > { %2520 = vmatmul.mubr.msk.f32.gmra.mrb[16].mxu1 %vm361_vm0, %v341_v45  ;;  %2491 = vmatmul.mubr.msk.f32.gmra.mrb[14].mxu0 %vm361_vm0, %v340_v44 }
  0x35   : > { %718 = vmatprep.mubr.f32.mxu1 %v3320_v7  ;;  %522 = vmatprep.mubr.f32.mxu0 %v3320_v7 }
  0x38   : > { %2521 = vmatmul.mubr.msk.f32.gmra.mrb[18].mxu1 %vm361_vm0, %v342_v46  ;;  %2492 = vmatmul.mubr.msk.f32.gmra.mrb[16].mxu0 %vm361_vm0, %v341_v45 }
  0x39   : > { %724 = vmatprep.mubr.f32.mxu1 %v3320_v7  ;;  %528 = vmatprep.mubr.f32.mxu0 %v3320_v7 }
  0x3c   : > { %2522 = vmatmul.mubr.msk.f32.gmra.mrb[20].mxu1 %vm361_vm0, %v343_v47  ;;  %2493 = vmatmul.mubr.msk.f32.gmra.mrb[18].mxu0 %vm361_vm0, %v342_v46 }
  0x3d   : > { %730 = vmatprep.mubr.f32.mxu1 %v3320_v7  ;;  %534 = vmatprep.mubr.f32.mxu0 %v3320_v7 }
  0x40   : > { %2523 = vmatmul.mubr.msk.f32.gmra.mrb[22].mxu1 %vm361_vm0, %v344_v48  ;;  %2494 = vmatmul.mubr.msk.f32.gmra.mrb[20].mxu0 %vm361_vm0, %v343_v47 }
  0x41   : > { %736 = vmatprep.mubr.f32.mxu1 %v3320_v7  ;;  %540 = vmatprep.mubr.f32.mxu0 %v3320_v7 }
  0x44   : > { %2524 = vmatmul.mubr.msk.f32.gmra.mrb[24].mxu1 %vm361_vm0, %v345_v49  ;;  %2495 = vmatmul.mubr.msk.f32.gmra.mrb[22].mxu0 %vm361_vm0, %v344_v48 }
  0x45   : > { %742 = vmatprep.mubr.f32.mxu1 %v3320_v7  ;;  %546 = vmatprep.mubr.f32.mxu0 %v3320_v7 }
  0x48   : > { %2525 = vmatmul.mubr.msk.f32.gmra.mrb[26].mxu1 %vm361_vm0, %v346_v50  ;;  %2496 = vmatmul.mubr.msk.f32.gmra.mrb[24].mxu0 %vm361_vm0, %v345_v49 }
  0x49   : > { %748 = vmatprep.mubr.f32.mxu1 %v3320_v7  ;;  %552 = vmatprep.mubr.f32.mxu0 %v3320_v7 }
  0x4c   : > { %2526 = vmatmul.mubr.msk.f32.gmra.mrb[28].mxu1 %vm361_vm0, %v347_v51  ;;  %2497 = vmatmul.mubr.msk.f32.gmra.mrb[26].mxu0 %vm361_vm0, %v346_v50 }
  0x4d   : > { %754 = vmatprep.mubr.f32.mxu1 %v3320_v7  ;;  %558 = vmatprep.mubr.f32.mxu0 %v3320_v7 }
  0x50   : > { %2527 = vmatmul.mubr.msk.f32.gmra.mrb[30].mxu1 %vm361_vm0, %v348_v52  ;;  %2498 = vmatmul.mubr.msk.f32.gmra.mrb[28].mxu0 %vm361_vm0, %v347_v51 }
  0x51   : > { %564 = vmatprep.mubr.f32.mxu0 %v3320_v7  ;;  %1243 = vmatprep.mubr.f32.mxu1 %v3320_v7 }
  0x54   : > { %2499 = vmatmul.mubr.msk.f32.gmra.mrb[30].mxu0 %vm361_vm0, %v348_v52 }
  0x55   : > { %842 = vmatprep.mubr.f32.mxu0 %v3320_v7 }
  0xe7   : > { %v666_v53 = vpop.f32.mrb[0].mxu1 }
  0xe8   : > { %v668_v54 = vpop.f32.mrb[1].mxu1 }
  0xeb   : > { %v672_v55 = vpop.f32.mrb[2].mxu1  ;;  %v3543_v56 = vpop.f32.mrb[0].mxu0 }
  0xec   : > { %v2935_v57 = vpack.c.bf16 %v672_v55, %v666_v53  ;;  %v674_v58 = vpop.f32.mrb[3].mxu1  ;;  %v3545_v59 = vpop.f32.mrb[1].mxu0 }
  0xed   : > { %v2933_v60 = vpack.c.bf16 %v674_v58, %v668_v54 }
  0xef   : > { %v678_v61 = vpop.f32.mrb[4].mxu1  ;;  %2934 = vmatprep.subr.bf16.mxu0 %v2933_v60  ;;  %v3547_v62 = vpop.f32.mrb[2].mxu0 }
  0xf0   : > { %v680_v63 = vpop.f32.mrb[5].mxu1  ;;  %2936 = vmatpush1.bf16.msra.mxu0 %v2935_v57  ;;  %v2967_v0 = vpack.c.bf16 %v3547_v62, %v3543_v56  ;;  %v3551_v1 = vpop.f32.mrb[3].mxu0 }
  0xf1   : > { %v2965_v2 = vpack.c.bf16 %v3551_v1, %v3545_v59  ;;  %v1158_v59 = vld [vmem:[%s4708_s4 + $0x58] sm:$0xff] }
  0xf3   : > { %v684_v3 = vpop.f32.mrb[6].mxu1  ;;  %v3555_v4 = vpop.f32.mrb[4].mxu0 }
  0xf4   : > { %v2939_v5 = vpack.c.bf16 %v684_v3, %v678_v61  ;;  %v686_v6 = vpop.f32.mrb[7].mxu1  ;;  %v3557_v8 = vpop.f32.mrb[5].mxu0 }
  0xf5   : > { %v2937_v9 = vpack.c.bf16 %v686_v6, %v680_v63 }
  0xf7   : > { %v690_v10 = vpop.f32.mrb[8].mxu1  ;;  %2938 = vmatprep.subr.bf16.mxu0 %v2937_v9  ;;  %v3559_v11 = vpop.f32.mrb[6].mxu0 }
  0xf8   : > { %v692_v12 = vpop.f32.mrb[9].mxu1  ;;  %2940 = vmatpush1.bf16.msra.mxu0 %v2939_v5  ;;  %v2971_v13 = vpack.c.bf16 %v3559_v11, %v3555_v4  ;;  %v3563_v14 = vpop.f32.mrb[7].mxu0  ;;  %v2532_v4 = vld [vmem:[%s4706_s2 + $0xa0] sm:$0xff]  ;;  %v2533_v11 = vld [vmem:[%s4706_s2 + $0xa8] sm:$0xff] }
  0xf9   : > { %v2969_v15 = vpack.c.bf16 %v3563_v14, %v3557_v8  ;;  %v2531_v8 = vld [vmem:[%s4706_s2 + $0x98] sm:$0xff] }
  0xfa   : > { %v2535_v14 = vld [vmem:[%s4706_s2 + $0xb8] sm:$0xff] }
  0xfb   : > { %v696_v16 = vpop.f32.mrb[10].mxu1  ;;  %v3567_v17 = vpop.f32.mrb[8].mxu0 }
  0xfc   : > { %v2943_v18 = vpack.c.bf16 %v696_v16, %v690_v10  ;;  %v698_v19 = vpop.f32.mrb[11].mxu1  ;;  %v3569_v20 = vpop.f32.mrb[9].mxu0 }
  0xfd   : > { %v2941_v21 = vpack.c.bf16 %v698_v19, %v692_v12 }
  0xff   : > { %v702_v22 = vpop.f32.mrb[12].mxu1  ;;  %2942 = vmatprep.subr.bf16.mxu0 %v2941_v21  ;;  %v3571_v23 = vpop.f32.mrb[10].mxu0 }
 0x100   : > { %v704_v24 = vpop.f32.mrb[13].mxu1  ;;  %2944 = vmatpush1.bf16.msra.mxu0 %v2943_v18  ;;  %v2975_v25 = vpack.c.bf16 %v3571_v23, %v3567_v17  ;;  %v3575_v26 = vpop.f32.mrb[11].mxu0  ;;  %v2537_v17 = vld [vmem:[%s4706_s2 + $0xc8] sm:$0xff]  ;;  %v2539_v23 = vld [vmem:[%s4706_s2 + $0xd8] sm:$0xff] }
 0x101   : > { %v2973_v27 = vpack.c.bf16 %v3575_v26, %v3569_v20  ;;  %v2538_v20 = vld [vmem:[%s4706_s2 + $0xd0] sm:$0xff]  ;;  %v2541_v26 = vld [vmem:[%s4706_s2 + $0xe8] sm:$0xff] }
 0x103   : > { %v708_v28 = vpop.f32.mrb[14].mxu1  ;;  %v3579_v29 = vpop.f32.mrb[12].mxu0 }
 0x104   : > { %v2947_v30 = vpack.c.bf16 %v708_v28, %v702_v22  ;;  %v710_v31 = vpop.f32.mrb[15].mxu1  ;;  %v3581_v32 = vpop.f32.mrb[13].mxu0 }
 0x105   : > { %v2945_v33 = vpack.c.bf16 %v710_v31, %v704_v24 }
 0x107   : > { %v714_v34 = vpop.f32.mrb[16].mxu1  ;;  %2946 = vmatprep.subr.bf16.mxu0 %v2945_v33  ;;  %v3583_v35 = vpop.f32.mrb[14].mxu0 }
 0x108   : > { %v716_v36 = vpop.f32.mrb[17].mxu1  ;;  %2948 = vmatpush1.bf16.msra.mxu0 %v2947_v30  ;;  %v2979_v37 = vpack.c.bf16 %v3583_v35, %v3579_v29  ;;  %v3587_v38 = vpop.f32.mrb[15].mxu0  ;;  %v2543_v29 = vld [vmem:[%s4706_s2 + $0xf8] sm:$0xff]  ;;  %v572_v35 = vld [vmem:[%s4706_s2 + $0x8] sm:$0xff] }
 0x109   : > { %v2977_v39 = vpack.c.bf16 %v3587_v38, %v3581_v32  ;;  %v571_v32 = vld [vmem:[%s4706_s2] sm:$0xff]  ;;  %v574_v38 = vld [vmem:[%s4706_s2 + $0x18] sm:$0xff] }
 0x10b   : > { %v720_v40 = vpop.f32.mrb[18].mxu1  ;;  %v3591_v41 = vpop.f32.mrb[16].mxu0 }
 0x10c   : > { %v2951_v42 = vpack.c.bf16 %v720_v40, %v714_v34  ;;  %v722_v43 = vpop.f32.mrb[19].mxu1  ;;  %v3593_v44 = vpop.f32.mrb[17].mxu0 }
 0x10d   : > { %v2949_v45 = vpack.c.bf16 %v722_v43, %v716_v36 }
 0x10f   : > { %v726_v46 = vpop.f32.mrb[20].mxu1  ;;  %2950 = vmatprep.subr.bf16.mxu0 %v2949_v45  ;;  %v3595_v47 = vpop.f32.mrb[18].mxu0  ;;  %v2528_v45 = vld [vmem:[%s4706_s2 + $0x80] sm:$0xff] }
 0x110   : > { %v728_v48 = vpop.f32.mrb[21].mxu1  ;;  %2952 = vmatpush1.bf16.msra.mxu0 %v2951_v42  ;;  %v2983_v49 = vpack.c.bf16 %v3595_v47, %v3591_v41  ;;  %v3599_v50 = vpop.f32.mrb[19].mxu0  ;;  %v576_v41 = vld [vmem:[%s4706_s2 + $0x28] sm:$0xff]  ;;  %v578_v47 = vld [vmem:[%s4706_s2 + $0x38] sm:$0xff] }
 0x111   : > { %v2981_v51 = vpack.c.bf16 %v3599_v50, %v3593_v44  ;;  %v577_v44 = vld [vmem:[%s4706_s2 + $0x30] sm:$0xff]  ;;  %v580_v50 = vld [vmem:[%s4706_s2 + $0x48] sm:$0xff] }
 0x113   : > { %v732_v52 = vpop.f32.mrb[22].mxu1  ;;  %v3603_v53 = vpop.f32.mrb[20].mxu0 }
 0x114   : > { %v2955_v54 = vpack.c.bf16 %v732_v52, %v726_v46  ;;  %v734_v55 = vpop.f32.mrb[23].mxu1  ;;  %v3605_v57 = vpop.f32.mrb[21].mxu0  ;;  %v1150_v52 = vld [vmem:[%s4708_s4 + $0x18] sm:$0xff] }
 0x115   : > { %v2953_v58 = vpack.c.bf16 %v734_v55, %v728_v48  ;;  %v1148_v48 = vld [vmem:[%s4708_s4 + $0x8] sm:$0xff] }
 0x117   : > { %v738_v60 = vpop.f32.mrb[24].mxu1  ;;  %2954 = vmatprep.subr.bf16.mxu0 %v2953_v58  ;;  %v3607_v61 = vpop.f32.mrb[22].mxu0 }
 0x118   : > { %v740_v63 = vpop.f32.mrb[25].mxu1  ;;  %2956 = vmatpush1.bf16.msra.mxu0 %v2955_v54  ;;  %v2987_v3 = vpack.c.bf16 %v3607_v61, %v3603_v53  ;;  %v3611_v5 = vpop.f32.mrb[23].mxu0  ;;  %v1147_v54 = vld [vmem:[%s4708_s4] sm:$0xff]  ;;  %v582_v53 = vld [vmem:[%s4706_s2 + $0x58] sm:$0xff]  ;;  %v584_v61 = vld [vmem:[%s4706_s2 + $0x68] sm:$0xff] }
 0x119   : > { %v2985_v6 = vpack.c.bf16 %v3611_v5, %v3605_v57  ;;  %v583_v57 = vld [vmem:[%s4706_s2 + $0x60] sm:$0xff]  ;;  %v586_v5 = vld [vmem:[%s4706_s2 + $0x78] sm:$0xff] }
 0x11b   : > { %v744_v9 = vpop.f32.mrb[26].mxu1  ;;  %v3615_v10 = vpop.f32.mrb[24].mxu0 }
 0x11c   : > { %v2959_v12 = vpack.c.bf16 %v744_v9, %v738_v60  ;;  %v746_v16 = vpop.f32.mrb[27].mxu1  ;;  %v3617_v18 = vpop.f32.mrb[25].mxu0  ;;  %v2997_v60 = vpack.c.bf16 %v1150_v52, %v1148_v48  ;;  %v1152_v9 = vld [vmem:[%s4708_s4 + $0x28] sm:$0xff] }
 0x11d   : > { %v2957_v19 = vpack.c.bf16 %v746_v16, %v740_v63  ;;  %v1149_v63 = vld [vmem:[%s4708_s4 + $0x10] sm:$0xff]  ;;  %v2606_v52 = vld [vmem:[%s4708_s4 + $0x228] sm:$0xff] }
 0x11e   : > { %2998 = vmatprep.subr.bf16.mxu1 %v2997_v60  ;;  %v2607_v60 = vld [vmem:[%s4708_s4 + $0x230] sm:$0xff] }
 0x11f   : > { %v750_v21 = vpop.f32.mrb[28].mxu1  ;;  %2958 = vmatprep.subr.bf16.mxu0 %v2957_v19  ;;  %v3619_v22 = vpop.f32.mrb[26].mxu0  ;;  %v2999_v19 = vpack.c.bf16 %v1149_v63, %v1147_v54  ;;  %v2608_v54 = vld [vmem:[%s4708_s4 + $0x238] sm:$0xff] }
 0x120   : > { %v752_v24 = vpop.f32.mrb[29].mxu1  ;;  %2960 = vmatpush1.bf16.msra.mxu0 %v2959_v12  ;;  %v2991_v28 = vpack.c.bf16 %v3619_v22, %v3615_v10  ;;  %v3623_v30 = vpop.f32.mrb[27].mxu0  ;;  %v1154_v12 = vld [vmem:[%s4708_s4 + $0x38] sm:$0xff] }
 0x121   : > { %v2989_v31 = vpack.c.bf16 %v3623_v30, %v3617_v18  ;;  %3000 = vmatpush1.bf16.msra.mxu1 %v2999_v19  ;;  %v1162_v10 = vld [vmem:[%s4708_s4 + $0x78] sm:$0xff]  ;;  %v1159_v18 = vld [vmem:[%s4708_s4 + $0x60] sm:$0xff]  ;;  %v2602_v30 = vld [vmem:[%s4708_s4 + $0x208] sm:$0xff] }
 0x123   : > { %v756_v33 = vpop.f32.mrb[30].mxu1  ;;  %v3627_v34 = vpop.f32.mrb[28].mxu0 }
 0x124   : > { %v2963_v36 = vpack.c.bf16 %v756_v33, %v750_v21  ;;  %v758_v40 = vpop.f32.mrb[31].mxu1  ;;  %v3629_v42 = vpop.f32.mrb[29].mxu0  ;;  %v3001_v21 = vpack.c.bf16 %v1154_v12, %v1152_v9  ;;  %v1153_v33 = vld [vmem:[%s4708_s4 + $0x30] sm:$0xff]  ;;  %v1164_v9 = vld [vmem:[%s4708_s4 + $0x88] sm:$0xff]  ;;  %v1166_v12 = vld [vmem:[%s4708_s4 + $0x98] sm:$0xff] }
 0x125   : > { %v2961_v43 = vpack.c.bf16 %v758_v40, %v752_v24  ;;  %v1151_v24 = vld [vmem:[%s4708_s4 + $0x20] sm:$0xff]  ;;  %v1157_v40 = vld [vmem:[%s4708_s4 + $0x50] sm:$0xff]  ;;  %v3013_v19 = vpack.c.bf16 %v1166_v12, %v1164_v9 }
 0x126   : > { %v3003_v1 = vpack.c.bf16 %v1153_v33, %v1151_v24  ;;  %3002 = vmatprep.subr.bf16.mxu1 %v3001_v21  ;;  %v1165_v21 = vld [vmem:[%s4708_s4 + $0x90] sm:$0xff]  ;;  %v2610_v24 = vld [vmem:[%s4708_s4 + $0x248] sm:$0xff]  ;;  %v2612_v33 = vld [vmem:[%s4708_s4 + $0x258] sm:$0xff] }
 0x127   : > { %2962 = vmatprep.subr.bf16.mxu0 %v2961_v43  ;;  %v3634_v46 = vpop.f32.mrb[30].mxu0 }
 0x128   : > { %2964 = vmatpush1.bf16.msra.mxu0 %v2963_v36  ;;  %v2995_v55 = vpack.c.bf16 %v3634_v46, %v3627_v34  ;;  %v568_v58 = vpop.f32.mrb[31].mxu0  ;;  %v1156_v34 = vld [vmem:[%s4708_s4 + $0x48] sm:$0xff]  ;;  %v1155_v36 = vld [vmem:[%s4708_s4 + $0x40] sm:$0xff]  ;;  %3004 = vmatpush1.bf16.msra.mxu1 %v3003_v1  ;;  %v2603_v46 = vld [vmem:[%s4708_s4 + $0x210] sm:$0xff] }
 0x129   : > { %2966 = vmatprep.subr.bf16.mxu0 %v2965_v2  ;;  %v2993_v16 = vpack.c.bf16 %v568_v58, %v3629_v42  ;;  %v2529_v2 = vld [vmem:[%s4706_s2 + $0x88] sm:$0xff]  ;;  %v3005_v56 = vpack.c.bf16 %v1158_v59, %v1156_v34  ;;  %v3007_v62 = vpack.c.bf16 %v1157_v40, %v1155_v36  ;;  %v2605_v58 = vld [vmem:[%s4708_s4 + $0x220] sm:$0xff]  ;;  %v3101_v59 = vpack.c.bf16 %v2612_v33, %v2610_v24 }
 0x12a   : > { %v3099_v63 = vpack.c.bf16 %v2607_v60, %v2605_v58  ;;  %v2609_v1 = vld [vmem:[%s4708_s4 + $0x240] sm:$0xff]  ;;  %v2614_v40 = vld [vmem:[%s4708_s4 + $0x268] sm:$0xff]  ;;  %v2548_v60 = vld [vmem:[%s4708_s4 + $0x118] sm:$0xff] }
 0x12b   : > { %843 = vmatmul.mubr.f32.vlgmr.msra.gmra.mrb[32].mxu0 %v2528_v45  ;;  %3006 = vmatprep.subr.bf16.mxu1 %v3005_v56  ;;  %v2601_v45 = vld [vmem:[%s4708_s4 + $0x200] sm:$0xff]  ;;  %v2616_v56 = vld [vmem:[%s4708_s4 + $0x278] sm:$0xff]  ;;  %v2546_v58 = vld [vmem:[%s4708_s4 + $0x108] sm:$0xff] }
 0x12c   : > { %2968 = vmatpush1.bf16.msra.mxu0 %v2967_v0  ;;  %848 = vmatprep.mubr.f32.mxu0 %v3320_v7  ;;  %v2530_v0 = vld [vmem:[%s4706_s2 + $0x90] sm:$0xff]  ;;  %v3095_v48 = vpack.c.bf16 %v2603_v46, %v2601_v45 }
 0x12d   : > { %2970 = vmatprep.subr.bf16.mxu0 %v2969_v15  ;;  %3008 = vmatpush1.bf16.msra.mxu1 %v3007_v62  ;;  %v2536_v15 = vld [vmem:[%s4706_s2 + $0xc0] sm:$0xff]  ;;  %v3105_v62 = vpack.c.bf16 %v2616_v56, %v2614_v40  ;;  %v1177_v46 = vld [vmem:[%s4708_s4 + $0xf0] sm:$0xff] }
 0x12f   : > { %849 = vmatmul.mubr.f32.gmra.mrb[34].mxu0 %v2529_v2  ;;  %v2611_v2 = vld [vmem:[%s4708_s4 + $0x250] sm:$0xff] }
 0x130   : > { %854 = vmatprep.mubr.f32.mxu0 %v3320_v7  ;;  %2972 = vmatpush1.bf16.msra.mxu0 %v2971_v13  ;;  %v2534_v13 = vld [vmem:[%s4706_s2 + $0xb0] sm:$0xff]  ;;  %v3103_v36 = vpack.c.bf16 %v2611_v2, %v2609_v1 }
 0x131   : > { %2974 = vmatprep.subr.bf16.mxu0 %v2973_v27  ;;  %v2542_v27 = vld [vmem:[%s4706_s2 + $0xf0] sm:$0xff] }
 0x133   : > { %855 = vmatmul.mubr.f32.gmra.mrb[36].mxu0 %v2530_v0  ;;  %v2613_v0 = vld [vmem:[%s4708_s4 + $0x260] sm:$0xff] }
 0x134   : > { %860 = vmatprep.mubr.f32.mxu0 %v3320_v7  ;;  %2976 = vmatpush1.bf16.msra.mxu0 %v2975_v25  ;;  %v2540_v25 = vld [vmem:[%s4706_s2 + $0xe0] sm:$0xff] }
 0x135   : > { %2978 = vmatprep.subr.bf16.mxu0 %v2977_v39  ;;  %v575_v39 = vld [vmem:[%s4706_s2 + $0x20] sm:$0xff] }
 0x137   : > { %861 = vmatmul.mubr.f32.gmra.mrb[38].mxu0 %v2531_v8  ;;  %v2615_v8 = vld [vmem:[%s4708_s4 + $0x270] sm:$0xff] }
 0x138   : > { %866 = vmatprep.mubr.f32.mxu0 %v3320_v7  ;;  %2980 = vmatpush1.bf16.msra.mxu0 %v2979_v37  ;;  %v573_v37 = vld [vmem:[%s4706_s2 + $0x10] sm:$0xff] }
 0x139   : > { %2982 = vmatprep.subr.bf16.mxu0 %v2981_v51  ;;  %v581_v51 = vld [vmem:[%s4706_s2 + $0x50] sm:$0xff] }
 0x13b   : > { %867 = vmatmul.mubr.f32.gmra.mrb[40].mxu0 %v2532_v4  ;;  %v3107_v4 = vpack.c.bf16 %v2615_v8, %v2613_v0 }
 0x13c   : > { %872 = vmatprep.mubr.f32.mxu0 %v3320_v7  ;;  %2984 = vmatpush1.bf16.msra.mxu0 %v2983_v49  ;;  %v579_v49 = vld [vmem:[%s4706_s2 + $0x40] sm:$0xff] }
 0x13d   : > { %2986 = vmatprep.subr.bf16.mxu0 %v2985_v6  ;;  %v1160_v6 = vld [vmem:[%s4708_s4 + $0x68] sm:$0xff] }
 0x13e   : > { %v3009_v22 = vpack.c.bf16 %v1162_v10, %v1160_v6  ;;  %v2625_v6 = vld [vmem:[%s4708_s4 + $0x2c0] sm:$0xff]  ;;  %v2627_v10 = vld [vmem:[%s4708_s4 + $0x2d0] sm:$0xff] }
 0x13f   : > { %873 = vmatmul.mubr.f32.gmra.mrb[42].mxu0 %v2533_v11  ;;  %v1168_v11 = vld [vmem:[%s4708_s4 + $0xa8] sm:$0xff] }
 0x140   : > { %878 = vmatprep.mubr.f32.mxu0 %v3320_v7  ;;  %2988 = vmatpush1.bf16.msra.mxu0 %v2987_v3  ;;  %v585_v3 = vld [vmem:[%s4706_s2 + $0x70] sm:$0xff] }
 0x141   : > { %2990 = vmatprep.subr.bf16.mxu0 %v2989_v31  ;;  %v2604_v31 = vld [vmem:[%s4708_s4 + $0x218] sm:$0xff]  ;;  %3010 = vmatprep.subr.bf16.mxu1 %v3009_v22  ;;  %v1176_v22 = vld [vmem:[%s4708_s4 + $0xe8] sm:$0xff] }
 0x142   : > { %v3093_v43 = vpack.c.bf16 %v2604_v31, %v2602_v30  ;;  %v2630_v30 = vld [vmem:[%s4708_s4 + $0x2e8] sm:$0xff] }
 0x143   : > { %879 = vmatmul.mubr.f32.gmra.mrb[44].mxu0 %v2534_v13  ;;  %v1170_v13 = vld [vmem:[%s4708_s4 + $0xb8] sm:$0xff] }
 0x144   : > { %884 = vmatprep.mubr.f32.mxu0 %v3320_v7  ;;  %2992 = vmatpush1.bf16.msra.mxu0 %v2991_v28  ;;  %v1161_v28 = vld [vmem:[%s4708_s4 + $0x70] sm:$0xff] }
 0x145   : > { %2994 = vmatprep.subr.bf16.mxu0 %v2993_v16  ;;  %v3011_v42 = vpack.c.bf16 %v1161_v28, %v1159_v18  ;;  %v1163_v16 = vld [vmem:[%s4708_s4 + $0x80] sm:$0xff]  ;;  %v3119_v18 = vpack.c.bf16 %v2627_v10, %v2625_v6  ;;  %v1178_v28 = vld [vmem:[%s4708_s4 + $0xf8] sm:$0xff]  ;;  %v2554_v6 = vld [vmem:[%s4708_s4 + $0x148] sm:$0xff] }
 0x146   : > { %v3015_v34 = vpack.c.bf16 %v1165_v21, %v1163_v16  ;;  %v3025_v31 = vpack.c.bf16 %v1178_v28, %v1176_v22  ;;  %v2556_v10 = vld [vmem:[%s4708_s4 + $0x158] sm:$0xff] }
 0x147   : > { %885 = vmatmul.mubr.f32.gmra.mrb[46].mxu0 %v2535_v14  ;;  %3012 = vmatpush1.bf16.msra.mxu1 %v3011_v42  ;;  %v1167_v14 = vld [vmem:[%s4708_s4 + $0xa0] sm:$0xff]  ;;  %v2632_v42 = vld [vmem:[%s4708_s4 + $0x2f8] sm:$0xff] }
 0x148   : > { %890 = vmatprep.mubr.f32.mxu0 %v3320_v7  ;;  %2996 = vmatpush1.bf16.msra.mxu0 %v2995_v55  ;;  %v3097_v55 = vpack.c.bf16 %v2608_v54, %v2606_v52  ;;  %v3121_v45 = vpack.c.bf16 %v2632_v42, %v2630_v30  ;;  %v2631_v52 = vld [vmem:[%s4708_s4 + $0x2f0] sm:$0xff] }
 0x149   : > { %3094 = vmatprep.subr.bf16.mxu0 %v3093_v43  ;;  %3014 = vmatprep.subr.bf16.mxu1 %v3013_v19  ;;  %v1175_v43 = vld [vmem:[%s4708_s4 + $0xe0] sm:$0xff] }
 0x14a   : > { %v3027_v54 = vpack.c.bf16 %v1177_v46, %v1175_v43  ;;  %v3037_v43 = vpack.c.bf16 %v2556_v10, %v2554_v6  ;;  %v2555_v46 = vld [vmem:[%s4708_s4 + $0x150] sm:$0xff] }
 0x14b   : > { %891 = vmatmul.mubr.f32.gmra.mrb[48].mxu0 %v2536_v15  ;;  %3016 = vmatpush1.bf16.msra.mxu1 %v3015_v34  ;;  %v3017_v15 = vpack.c.bf16 %v1170_v13, %v1168_v11 }
 0x14c   : > { %896 = vmatprep.mubr.f32.mxu0 %v3320_v7 }
 0x14d   : > { %3018 = vmatprep.subr.bf16.mxu1 %v3017_v15 }
 0x14f   : > { %897 = vmatmul.mubr.f32.gmra.mrb[50].mxu0 %v2537_v17  ;;  %v1169_v17 = vld [vmem:[%s4708_s4 + $0xb0] sm:$0xff] }
 0x150   : > { %902 = vmatprep.mubr.f32.mxu0 %v3320_v7 }
 0x153   : > { %903 = vmatmul.mubr.f32.gmra.mrb[52].mxu0 %v2538_v20  ;;  %v2618_v20 = vld [vmem:[%s4708_s4 + $0x288] sm:$0xff] }
 0x154   : > { %908 = vmatprep.mubr.f32.mxu0 %v3320_v7 }
 0x157   : > { %909 = vmatmul.mubr.f32.gmra.mrb[54].mxu0 %v2539_v23  ;;  %v2620_v23 = vld [vmem:[%s4708_s4 + $0x298] sm:$0xff] }
 0x158   : > { %914 = vmatprep.mubr.f32.mxu0 %v3320_v7 }
 0x15b   : > { %915 = vmatmul.mubr.f32.gmra.mrb[56].mxu0 %v2540_v25  ;;  %v3019_v25 = vpack.c.bf16 %v1169_v17, %v1167_v14 }
 0x15c   : > { %920 = vmatprep.mubr.f32.mxu0 %v3320_v7 }
 0x15d   : > { %3020 = vmatpush1.bf16.msra.mxu1 %v3019_v25 }
 0x15f   : > { %921 = vmatmul.mubr.f32.gmra.mrb[58].mxu0 %v2541_v26  ;;  %v3109_v26 = vpack.c.bf16 %v2620_v23, %v2618_v20 }
 0x160   : > { %926 = vmatprep.mubr.f32.mxu0 %v3320_v7 }
 0x163   : > { %927 = vmatmul.mubr.f32.gmra.mrb[60].mxu0 %v2542_v27  ;;  %v2617_v27 = vld [vmem:[%s4708_s4 + $0x280] sm:$0xff] }
 0x164   : > { %932 = vmatprep.mubr.f32.mxu0 %v3320_v7 }
 0x167   : > { %933 = vmatmul.mubr.f32.gmra.mrb[62].mxu0 %v2543_v29  ;;  %v2619_v29 = vld [vmem:[%s4708_s4 + $0x290] sm:$0xff] }
 0x168   : > { %1003 = vmatprep.mubr.f32.mxu0 %v3320_v7 }
 0x16b   : > { %1004 = vmatmul.mubr.f32.vlgmr.msra.gmra.mrb[32].mxu0 %v571_v32  ;;  %v3111_v32 = vpack.c.bf16 %v2619_v29, %v2617_v27  ;;  %v4037_v27 = vld [vmem:[%s4707_s3] ss:$0 sm:$0xff] }
 0x16c   : > { %1009 = vmatprep.mubr.f32.mxu0 %v3320_v7  ;;  %3096 = vmatpush1.bf16.msra.mxu0 %v3095_v48  ;;  %v2629_v48 = vld [vmem:[%s4708_s4 + $0x2e0] sm:$0xff] }
 0x16d   : > { %3098 = vmatprep.subr.bf16.mxu0 %v3097_v55  ;;  %v3123_v55 = vpack.c.bf16 %v2631_v52, %v2629_v48  ;;  %v2558_v52 = vld [vmem:[%s4708_s4 + $0x168] sm:$0xff] }
 0x16f   : > { %1010 = vmatmul.mubr.f32.gmra.mrb[34].mxu0 %v572_v35  ;;  %v2622_v35 = vld [vmem:[%s4708_s4 + $0x2a8] sm:$0xff] }
 0x170   : > { %1015 = vmatprep.mubr.f32.mxu0 %v3320_v7  ;;  %3100 = vmatpush1.bf16.msra.mxu0 %v3099_v63  ;;  %v3029_v63 = vpack.c.bf16 %v2548_v60, %v2546_v58 }
 0x171   : > { %3102 = vmatprep.subr.bf16.mxu0 %v3101_v59 }
 0x173   : > { %1016 = vmatmul.mubr.f32.gmra.mrb[36].mxu0 %v573_v37  ;;  %v2624_v37 = vld [vmem:[%s4708_s4 + $0x2b8] sm:$0xff] }
 0x174   : > { %1021 = vmatprep.mubr.f32.mxu0 %v3320_v7  ;;  %3104 = vmatpush1.bf16.msra.mxu0 %v3103_v36 }
 0x175   : > { %3106 = vmatprep.subr.bf16.mxu0 %v3105_v62 }
 0x177   : > { %1022 = vmatmul.mubr.f32.gmra.mrb[38].mxu0 %v574_v38  ;;  %v3113_v38 = vpack.c.bf16 %v2624_v37, %v2622_v35  ;;  %v2545_v35 = vld [vmem:[%s4708_s4 + $0x100] sm:$0xff]  ;;  %v2547_v37 = vld [vmem:[%s4708_s4 + $0x110] sm:$0xff] }
 0x178   : > { %1027 = vmatprep.mubr.f32.mxu0 %v3320_v7  ;;  %3108 = vmatpush1.bf16.msra.mxu0 %v3107_v4 }
 0x179   : > { %3110 = vmatprep.subr.bf16.mxu0 %v3109_v26 }
 0x17b   : > { %1028 = vmatmul.mubr.f32.gmra.mrb[40].mxu0 %v575_v39  ;;  %v2621_v39 = vld [vmem:[%s4708_s4 + $0x2a0] sm:$0xff] }
 0x17c   : > { %1033 = vmatprep.mubr.f32.mxu0 %v3320_v7  ;;  %3112 = vmatpush1.bf16.msra.mxu0 %v3111_v32 }
 0x17d   : > { %3114 = vmatprep.subr.bf16.mxu0 %v3113_v38 }
 0x17f   : > { %1034 = vmatmul.mubr.f32.gmra.mrb[42].mxu0 %v576_v41  ;;  %v2623_v41 = vld [vmem:[%s4708_s4 + $0x2b0] sm:$0xff] }
 0x180   : > { %1039 = vmatprep.mubr.f32.mxu0 %v3320_v7 }
 0x183   : > { %1040 = vmatmul.mubr.f32.gmra.mrb[44].mxu0 %v577_v44  ;;  %v3115_v44 = vpack.c.bf16 %v2623_v41, %v2621_v39  ;;  %v2550_v39 = vld [vmem:[%s4708_s4 + $0x128] sm:$0xff]  ;;  %v2552_v41 = vld [vmem:[%s4708_s4 + $0x138] sm:$0xff] }
 0x184   : > { %1045 = vmatprep.mubr.f32.mxu0 %v3320_v7 }
 0x185   : > { %3116 = vmatpush1.bf16.msra.mxu0 %v3115_v44 }
 0x187   : > { %1046 = vmatmul.mubr.f32.gmra.mrb[46].mxu0 %v578_v47  ;;  %v1172_v47 = vld [vmem:[%s4708_s4 + $0xc8] sm:$0xff] }
 0x188   : > { %1051 = vmatprep.mubr.f32.mxu0 %v3320_v7 }
 0x18b   : > { %1052 = vmatmul.mubr.f32.gmra.mrb[48].mxu0 %v579_v49  ;;  %v1174_v49 = vld [vmem:[%s4708_s4 + $0xd8] sm:$0xff] }
 0x18c   : > { %1057 = vmatprep.mubr.f32.mxu0 %v3320_v7 }
 0x18f   : > { %1058 = vmatmul.mubr.f32.gmra.mrb[50].mxu0 %v580_v50  ;;  %v1171_v50 = vld [vmem:[%s4708_s4 + $0xc0] sm:$0xff] }
 0x190   : > { %1063 = vmatprep.mubr.f32.mxu0 %v3320_v7 }
 0x193   : > { %1064 = vmatmul.mubr.f32.gmra.mrb[52].mxu0 %v581_v51  ;;  %v3021_v51 = vpack.c.bf16 %v1174_v49, %v1172_v47  ;;  %v3031_v49 = vpack.c.bf16 %v2547_v37, %v2545_v35 }
 0x194   : > { %1069 = vmatprep.mubr.f32.mxu0 %v3320_v7 }
 0x195   : > { %3022 = vmatprep.subr.bf16.mxu1 %v3021_v51 }
 0x197   : > { %1070 = vmatmul.mubr.f32.gmra.mrb[54].mxu0 %v582_v53  ;;  %v1173_v53 = vld [vmem:[%s4708_s4 + $0xd0] sm:$0xff] }
 0x198   : > { %1075 = vmatprep.mubr.f32.mxu0 %v3320_v7 }
 0x19b   : > { %1076 = vmatmul.mubr.f32.gmra.mrb[56].mxu0 %v583_v57  ;;  %v2626_v57 = vld [vmem:[%s4708_s4 + $0x2c8] sm:$0xff] }
 0x19c   : > { %1081 = vmatprep.mubr.f32.mxu0 %v3320_v7 }
 0x19f   : > { %1082 = vmatmul.mubr.f32.gmra.mrb[58].mxu0 %v584_v61  ;;  %v2628_v61 = vld [vmem:[%s4708_s4 + $0x2d8] sm:$0xff] }
 0x1a0   : > { %1087 = vmatprep.mubr.f32.mxu0 %v3320_v7 }
 0x1a3   : > { %1088 = vmatmul.mubr.f32.gmra.mrb[60].mxu0 %v585_v3  ;;  %v3023_v3 = vpack.c.bf16 %v1173_v53, %v1171_v50 }
 0x1a4   : > { %1093 = vmatprep.mubr.f32.mxu0 %v3320_v7 }
 0x1a5   : > { %3024 = vmatpush1.bf16.msra.mxu1 %v3023_v3  ;;  %v2551_v3 = vld [vmem:[%s4708_s4 + $0x130] sm:$0xff] }
 0x1a6   : > { %3026 = vmatprep.subr.bf16.mxu1 %v3025_v31 }
 0x1a7   : > { %1094 = vmatmul.mubr.f32.gmra.mrb[62].mxu0 %v586_v5  ;;  %v3117_v5 = vpack.c.bf16 %v2628_v61, %v2626_v57  ;;  %v3033_v57 = vpack.c.bf16 %v2552_v41, %v2550_v39  ;;  %v2549_v61 = vld [vmem:[%s4708_s4 + $0x120] sm:$0xff] }
 0x1a8   : > { %1827 = vmatprep.mubr.f32.mxu0 %v3320_v7  ;;  %v3035_v28 = vpack.c.bf16 %v2551_v3, %v2549_v61 }
 0x1a9   : > { %3118 = vmatprep.subr.bf16.mxu0 %v3117_v5  ;;  %3028 = vmatpush1.bf16.msra.mxu1 %v3027_v54  ;;  %v2560_v54 = vld [vmem:[%s4708_s4 + $0x178] sm:$0xff] }
 0x1aa   : > { %3120 = vmatpush1.bf16.msra.mxu0 %v3119_v18  ;;  %3030 = vmatprep.subr.bf16.mxu1 %v3029_v63 }
 0x1ab   : > { %3122 = vmatprep.subr.bf16.mxu0 %v3121_v45  ;;  %v2553_v45 = vld [vmem:[%s4708_s4 + $0x140] sm:$0xff] }
 0x1ac   : > { %v3039_v60 = vpack.c.bf16 %v2555_v46, %v2553_v45 }
 0x1ae   : > { %3124 = vmatpush1.bf16.msra.mxu0 %v3123_v55 }
 0x23e   : > { %v1005_v9 = vpop.f32.mrb[32].mxu0 }
 0x23f   : > { %v1007_v12 = vpop.f32.mrb[33].mxu0 }
 0x240   : > { %v1100_v16 = vmax.f32 %v1005_v9, %v1007_v12 }
 0x242   : > { %v1011_v19 = vpop.f32.mrb[34].mxu0 }
 0x243   : > { %v1013_v21 = vpop.f32.mrb[35].mxu0 }
 0x244   : > { %v1101_v24 = vmax.f32 %v1011_v19, %v1013_v21  ;;  %v2557_v19 = vld [vmem:[%s4708_s4 + $0x160] sm:$0xff]  ;;  %v2559_v21 = vld [vmem:[%s4708_s4 + $0x170] sm:$0xff] }
 0x246   : > { %v1017_v33 = vpop.f32.mrb[36].mxu0 }
 0x247   : > { %v1019_v34 = vpop.f32.mrb[37].mxu0 }
 0x248   : > { %v1102_v59 = vmax.f32 %v1017_v33, %v1019_v34  ;;  %v2562_v33 = vld [vmem:[%s4708_s4 + $0x188] sm:$0xff]  ;;  %v2564_v34 = vld [vmem:[%s4708_s4 + $0x198] sm:$0xff] }
 0x24a   : > { %v4004_v1 = vpop.f32.mrb[38].mxu0 }
 0x24b   : > { %v4006_v2 = vpop.f32.mrb[39].mxu0 }
 0x24c   : > { %v1103_v36 = vmax.f32 %v4004_v1, %v4006_v2  ;;  %v3043_v2 = vpack.c.bf16 %v2559_v21, %v2557_v19 }
 0x24e   : > { %v4010_v40 = vpop.f32.mrb[40].mxu0 }
 0x24f   : > { %v4012_v56 = vpop.f32.mrb[41].mxu0 }
 0x250   : > { %v1104_v62 = vmax.f32 %v4010_v40, %v4012_v56  ;;  %v2566_v40 = vld [vmem:[%s4708_s4 + $0x1a8] sm:$0xff]  ;;  %v2568_v56 = vld [vmem:[%s4708_s4 + $0x1b8] sm:$0xff] }
 0x252   : > { %v4016_v0 = vpop.f32.mrb[42].mxu0 }
 0x253   : > { %v4018_v8 = vpop.f32.mrb[43].mxu0 }
 0x254   : > { %v1105_v4 = vmax.f32 %v4016_v0, %v4018_v8  ;;  %v2570_v0 = vld [vmem:[%s4708_s4 + $0x1c8] sm:$0xff]  ;;  %v2572_v8 = vld [vmem:[%s4708_s4 + $0x1d8] sm:$0xff] }
 0x255   : > { %v3053_v10 = vpack.c.bf16 %v2572_v8, %v2570_v0 }
 0x256   : > { %v4022_v11 = vpop.f32.mrb[44].mxu0 }
 0x257   : > { %v4024_v13 = vpop.f32.mrb[45].mxu0 }
 0x258   : > { %v1106_v14 = vmax.f32 %v4022_v11, %v4024_v13  ;;  %v2574_v11 = vld [vmem:[%s4708_s4 + $0x1e8] sm:$0xff]  ;;  %v2576_v13 = vld [vmem:[%s4708_s4 + $0x1f8] sm:$0xff] }
 0x259   : > { %v3057_v46 = vpack.c.bf16 %v2576_v13, %v2574_v11  ;;  %v4714_v13 = vmov 0.0|0.0  }
 0x25a   : > { %v4028_v15 = vpop.f32.mrb[46].mxu0  ;;  %3141 = vmatprep.subr.bf16.mxu0 %v4714_v13 }
 0x25b   : > { %v4030_v17 = vpop.f32.mrb[47].mxu0 }
 0x25c   : > { %v1107_v20 = vmax.f32 %v4028_v15, %v4030_v17 }
 0x25e   : > { %v1053_v23 = vpop.f32.mrb[48].mxu0 }
 0x25f   : > { %v1055_v25 = vpop.f32.mrb[49].mxu0 }
 0x260   : > { %v1108_v26 = vmax.f32 %v1053_v23, %v1055_v25 }
 0x262   : > { %v1116_v29 = vmax.f32 %v1100_v16, %v1108_v26  ;;  %v1059_v32 = vpop.f32.mrb[50].mxu0  ;;  %v3041_v16 = vpack.c.bf16 %v2560_v54, %v2558_v52  ;;  %v3045_v26 = vpack.c.bf16 %v2564_v34, %v2562_v33  ;;  %v2575_v52 = vld [vmem:[%s4708_s4 + $0x1f0] sm:$0xff] }
 0x263   : > { %v1061_v38 = vpop.f32.mrb[51].mxu0 }
 0x264   : > { %v1131_v44 = vadd.f32 %v4037_v27, %v1116_v29  ;;  %v1109_v47 = vmax.f32 %v1059_v32, %v1061_v38  ;;  %v2561_v29 = vld [vmem:[%s4708_s4 + $0x180] sm:$0xff]  ;;  %v2563_v32 = vld [vmem:[%s4708_s4 + $0x190] sm:$0xff] }
 0x265   : > { %v3047_v38 = vpack.c.bf16 %v2563_v32, %v2561_v29 }
 0x266   : > { %v4052_v50 = vmax.f32 %v1131_v44, 0.0  ;;  %v1117_v51 = vmax.f32 %v1101_v24, %v1109_v47  ;;  %v1065_v53 = vpop.f32.mrb[52].mxu0  ;;  %v3049_v47 = vpack.c.bf16 %v2568_v56, %v2566_v40 }
 0x267   : > { %v1067_v5 = vpop.f32.mrb[53].mxu0 }
 0x268   : > { %v1110_v18 = vmax.f32 %v1065_v53, %v1067_v5  ;;  %1244 = vmatmul.mubr.f32.vlgmr.msra.gmra.mrb[32].mxu1 %v4052_v50  ;;  %1828 = vmatmul.mubr.f32.vlgmr.msra.gmra.mrb[64].mxu0 %v4052_v50  ;;  %v1132_v22 = vadd.f32 %v4037_v27, %v1117_v51  ;;  %v2567_v51 = vld [vmem:[%s4708_s4 + $0x1b0] sm:$0xff] }
 0x269   : > { %3032 = vmatpush1.bf16.msra.mxu1 %v3031_v49  ;;  %1249 = vmatprep.mubr.f32.mxu1 %v3320_v7  ;;  %v2565_v49 = vld [vmem:[%s4708_s4 + $0x1a0] sm:$0xff] }
 0x26a   : > { %v1118_v30 = vmax.f32 %v1102_v59, %v1110_v18  ;;  %v1071_v31 = vpop.f32.mrb[54].mxu0  ;;  %1833 = vmatprep.mubr.f32.mxu0 %v3320_v7  ;;  %v4071_v42 = vmax.f32 %v1132_v22, 0.0  ;;  %3034 = vmatprep.subr.bf16.mxu1 %v3033_v57  ;;  %v3051_v61 = vpack.c.bf16 %v2567_v51, %v2565_v49  ;;  %v2569_v18 = vld [vmem:[%s4708_s4 + $0x1c0] sm:$0xff]  ;;  %v2571_v22 = vld [vmem:[%s4708_s4 + $0x1d0] sm:$0xff] }
 0x26b   : > { %v1073_v48 = vpop.f32.mrb[55].mxu0 }
 0x26c   : > { %v1111_v55 = vmax.f32 %v1071_v31, %v1073_v48  ;;  %1250 = vmatmul.mubr.f32.gmra.mrb[34].mxu1 %v4071_v42  ;;  %1834 = vmatmul.mubr.f32.gmra.mrb[66].mxu0 %v4071_v42  ;;  %v1133_v58 = vadd.f32 %v4037_v27, %v1118_v30  ;;  %v3055_v31 = vpack.c.bf16 %v2571_v22, %v2569_v18  ;;  %v2573_v48 = vld [vmem:[%s4708_s4 + $0x1e0] sm:$0xff] }
 0x26d   : > { %3036 = vmatpush1.bf16.msra.mxu1 %v3035_v28  ;;  %1255 = vmatprep.mubr.f32.mxu1 %v3320_v7  ;;  %v3059_v15 = vpack.c.bf16 %v2575_v52, %v2573_v48 }
 0x26e   : > { %v1119_v63 = vmax.f32 %v1103_v36, %v1111_v55  ;;  %v1077_v9 = vpop.f32.mrb[56].mxu0  ;;  %1839 = vmatprep.mubr.f32.mxu0 %v3320_v7  ;;  %v4090_v12 = vmax.f32 %v1133_v58, 0.0  ;;  %3038 = vmatprep.subr.bf16.mxu1 %v3037_v43 }
 0x26f   : > { %v1079_v24 = vpop.f32.mrb[57].mxu0 }
 0x270   : > { %v1112_v59 = vmax.f32 %v1077_v9, %v1079_v24  ;;  %1256 = vmatmul.mubr.f32.gmra.mrb[36].mxu1 %v4090_v12  ;;  %1840 = vmatmul.mubr.f32.gmra.mrb[68].mxu0 %v4090_v12  ;;  %v1134_v1 = vadd.f32 %v4037_v27, %v1119_v63 }
 0x271   : > { %3040 = vmatpush1.bf16.msra.mxu1 %v3039_v60  ;;  %1261 = vmatprep.mubr.f32.mxu1 %v3320_v7 }
 0x272   : > { %v1120_v36 = vmax.f32 %v1104_v62, %v1112_v59  ;;  %v1083_v23 = vpop.f32.mrb[58].mxu0  ;;  %1845 = vmatprep.mubr.f32.mxu0 %v3320_v7  ;;  %v4112_v25 = vmax.f32 %v1134_v1, 0.0  ;;  %3042 = vmatprep.subr.bf16.mxu1 %v3041_v16 }
 0x273   : > { %v1085_v35 = vpop.f32.mrb[59].mxu0 }
 0x274   : > { %v1113_v62 = vmax.f32 %v1083_v23, %v1085_v35  ;;  %1262 = vmatmul.mubr.f32.gmra.mrb[38].mxu1 %v4112_v25  ;;  %1846 = vmatmul.mubr.f32.gmra.mrb[70].mxu0 %v4112_v25  ;;  %v1135_v37 = vadd.f32 %v4037_v27, %v1120_v36 }
 0x275   : > { %3044 = vmatpush1.bf16.msra.mxu1 %v3043_v2  ;;  %1267 = vmatprep.mubr.f32.mxu1 %v3320_v7 }
 0x276   : > { %v1121_v39 = vmax.f32 %v1105_v4, %v1113_v62  ;;  %v1089_v41 = vpop.f32.mrb[60].mxu0  ;;  %1851 = vmatprep.mubr.f32.mxu0 %v3320_v7  ;;  %v1143_v44 = vmax.f32 %v1135_v37, 0.0  ;;  %3046 = vmatprep.subr.bf16.mxu1 %v3045_v26 }
 0x277   : > { %v1091_v53 = vpop.f32.mrb[61].mxu0 }
 0x278   : > { %v1114_v4 = vmax.f32 %v1089_v41, %v1091_v53  ;;  %1268 = vmatmul.mubr.f32.gmra.mrb[40].mxu1 %v1143_v44  ;;  %1852 = vmatmul.mubr.f32.gmra.mrb[72].mxu0 %v1143_v44  ;;  %v1136_v57 = vadd.f32 %v4037_v27, %v1121_v39 }
 0x279   : > { %3048 = vmatpush1.bf16.msra.mxu1 %v3047_v38  ;;  %1273 = vmatprep.mubr.f32.mxu1 %v3320_v7 }
 0x27a   : > { %v1122_v3 = vmax.f32 %v1106_v14, %v1114_v4  ;;  %v1095_v5 = vpop.f32.mrb[62].mxu0  ;;  %1857 = vmatprep.mubr.f32.mxu0 %v3320_v7  ;;  %v1144_v6 = vmax.f32 %v1136_v57, 0.0  ;;  %3050 = vmatprep.subr.bf16.mxu1 %v3049_v47 }
 0x27b   : > { %v1097_v28 = vpop.f32.mrb[63].mxu0 }
 0x27c   : > { %v1115_v14 = vmax.f32 %v1095_v5, %v1097_v28  ;;  %1274 = vmatmul.mubr.f32.gmra.mrb[42].mxu1 %v1144_v6  ;;  %1858 = vmatmul.mubr.f32.gmra.mrb[74].mxu0 %v1144_v6  ;;  %v1137_v30 = vadd.f32 %v4037_v27, %v1122_v3  ;;  %v2650_v28 = vld [vmem:[%s4711_s7 + $0x80] sm:$0xff] }
 0x27d   : > { %3052 = vmatpush1.bf16.msra.mxu1 %v3051_v61  ;;  %1279 = vmatprep.mubr.f32.mxu1 %v3320_v7 }
 0x27e   : > { %v1123_v43 = vmax.f32 %v1107_v20, %v1115_v14  ;;  %1863 = vmatprep.mubr.f32.mxu0 %v3320_v7  ;;  %v1145_v45 = vmax.f32 %v1137_v30, 0.0  ;;  %3054 = vmatprep.subr.bf16.mxu1 %v3053_v10  ;;  %v2651_v14 = vld [vmem:[%s4711_s7 + $0x88] sm:$0xff] }
 0x27f   : > { %v3142_v30 = vpack.c.bf16 %v2651_v14, %v2650_v28 }
 0x280   : > { %1280 = vmatmul.mubr.f32.gmra.mrb[44].mxu1 %v1145_v45  ;;  %1864 = vmatmul.mubr.f32.gmra.mrb[76].mxu0 %v1145_v45  ;;  %v1138_v54 = vadd.f32 %v4037_v27, %v1123_v43 }
 0x281   : > { %3056 = vmatpush1.bf16.msra.mxu1 %v3055_v31  ;;  %1285 = vmatprep.mubr.f32.mxu1 %v3320_v7 }
 0x282   : > { %1869 = vmatprep.mubr.f32.mxu0 %v3320_v7  ;;  %v1146_v17 = vmax.f32 %v1138_v54, 0.0  ;;  %3058 = vmatprep.subr.bf16.mxu1 %v3057_v46 }
 0x283   : > { %3143 = vmatpush3.bf16.msra.mxu0 %v3142_v30 }
 0x284   : > { %1286 = vmatmul.mubr.f32.gmra.mrb[46].mxu1 %v1146_v17  ;;  %1870 = vmatmul.mubr.f32.gmra.mrb[78].mxu0 %v1146_v17 }
 0x285   : > { %3060 = vmatpush1.bf16.msra.mxu1 %v3059_v15  ;;  %1397 = vmatprep.mubr.f32.mxu1 %v3320_v7 }
 0x286   : > { %3144 = vmatprep.subr.bf16.mxu0 %v4714_v13  ;;  %2801 = vmatprep.mubr.msk.f32.mxu0 %vm3322_vm2, %v3320_v7 }
 0x288   : > { %1398 = vmatmul.mubr.f32.vlgmr.msra.gmra.mrb[48].mxu1 %v4052_v50 }
 0x289   : > { %1403 = vmatprep.mubr.f32.mxu1 %v3320_v7 }
 0x28c   : > { %1404 = vmatmul.mubr.f32.gmra.mrb[50].mxu1 %v4071_v42 }
 0x28d   : > { %1409 = vmatprep.mubr.f32.mxu1 %v3320_v7 }
 0x290   : > { %1410 = vmatmul.mubr.f32.gmra.mrb[52].mxu1 %v4090_v12 }
 0x291   : > { %1415 = vmatprep.mubr.f32.mxu1 %v3320_v7 }
 0x294   : > { %1416 = vmatmul.mubr.f32.gmra.mrb[54].mxu1 %v4112_v25 }
 0x295   : > { %1421 = vmatprep.mubr.f32.mxu1 %v3320_v7 }
 0x298   : > { %1422 = vmatmul.mubr.f32.gmra.mrb[56].mxu1 %v1143_v44 }
 0x299   : > { %1427 = vmatprep.mubr.f32.mxu1 %v3320_v7 }
 0x29c   : > { %1428 = vmatmul.mubr.f32.gmra.mrb[58].mxu1 %v1144_v6 }
 0x29d   : > { %1433 = vmatprep.mubr.f32.mxu1 %v3320_v7 }
 0x2a0   : > { %1434 = vmatmul.mubr.f32.gmra.mrb[60].mxu1 %v1145_v45 }
 0x2a1   : > { %1439 = vmatprep.mubr.f32.mxu1 %v3320_v7 }
 0x2a4   : > { %1440 = vmatmul.mubr.f32.gmra.mrb[62].mxu1 %v1146_v17 }
 0x2a5   : > { %1544 = vmatprep.mubr.f32.mxu1 %v3320_v7 }
 0x33b   : > { %v4192_v20 = vpop.f32.mrb[32].mxu1  ;;  %v4194_v27 = vpop.f32.mrb[64].mxu0 }
 0x33c   : > { %v4196_v50 = vpop.f32.mrb[33].mxu1  ;;  %v4198_v42 = vpop.f32.mrb[65].mxu0 }
 0x33f   : > { %v4200_v55 = vpop.f32.mrb[34].mxu1  ;;  %v4202_v58 = vpop.f32.mrb[66].mxu0 }
 0x340   : > { %v3079_v60 = vpack.c.bf16 %v4200_v55, %v4192_v20  ;;  %v3127_v63 = vpack.c.bf16 %v4202_v58, %v4194_v27  ;;  %v4208_v9 = vpop.f32.mrb[35].mxu1  ;;  %v4210_v12 = vpop.f32.mrb[67].mxu0  ;;  %v2579_v20 = vld [vmem:[%s4709_s5 + $0x50] sm:$0xff]  ;;  %v2581_v55 = vld [vmem:[%s4709_s5 + $0x60] sm:$0xff]  ;;  %v1295_v58 = vld [vmem:[%s4709_s5 + $0x18] sm:$0xff] }
 0x341   : > { %v3077_v16 = vpack.c.bf16 %v4208_v9, %v4196_v50  ;;  %v3125_v19 = vpack.c.bf16 %v4210_v12, %v4198_v42  ;;  %v2580_v50 = vld [vmem:[%s4709_s5 + $0x58] sm:$0xff]  ;;  %v2583_v9 = vld [vmem:[%s4709_s5 + $0x70] sm:$0xff]  ;;  %v1292_v12 = vld [vmem:[%s4709_s5] sm:$0xff] }
 0x342   : > { %v2584_v42 = vld [vmem:[%s4709_s5 + $0x78] sm:$0xff]  ;;  %v1294_v27 = vld [vmem:[%s4709_s5 + $0x10] sm:$0xff] }
 0x343   : > { %v4216_v21 = vpop.f32.mrb[36].mxu1  ;;  %v4218_v24 = vpop.f32.mrb[68].mxu0 }
 0x344   : > { %v4220_v33 = vpop.f32.mrb[37].mxu1  ;;  %v4222_v34 = vpop.f32.mrb[69].mxu0 }
 0x347   : > { %v4224_v59 = vpop.f32.mrb[38].mxu1  ;;  %v4226_v1 = vpop.f32.mrb[70].mxu0 }
 0x348   : > { %v3083_v2 = vpack.c.bf16 %v4224_v59, %v4216_v21  ;;  %v3131_v36 = vpack.c.bf16 %v4226_v1, %v4218_v24  ;;  %v4232_v23 = vpop.f32.mrb[39].mxu1  ;;  %v4234_v25 = vpop.f32.mrb[71].mxu0  ;;  %v4717_v21 = vmov 0.0|0.0   ;;  %v1297_v24 = vld [vmem:[%s4709_s5 + $0x28] sm:$0xff]  ;;  %v2065_v59 = vld [vmem:[%s4711_s7] sm:$0xff] }
 0x349   : > { %v3081_v26 = vpack.c.bf16 %v4232_v23, %v4220_v33  ;;  %v3129_v29 = vpack.c.bf16 %v4234_v25, %v4222_v34  ;;  %v1298_v33 = vld [vmem:[%s4709_s5 + $0x30] sm:$0xff]  ;;  %v1299_v34 = vld [vmem:[%s4709_s5 + $0x38] sm:$0xff]  ;;  %v2066_v1 = vld [vmem:[%s4711_s7 + $0x8] sm:$0xff] }
 0x34a   : > { %v2067_v23 = vld [vmem:[%s4711_s7 + $0x10] sm:$0xff]  ;;  %v2068_v25 = vld [vmem:[%s4711_s7 + $0x18] sm:$0xff] }
 0x34b   : > { %v4240_v32 = vpop.f32.mrb[40].mxu1  ;;  %v4242_v35 = vpop.f32.mrb[72].mxu0 }
 0x34c   : > { %v4244_v40 = vpop.f32.mrb[41].mxu1  ;;  %v4246_v56 = vpop.f32.mrb[73].mxu0 }
 0x34f   : > { %v4248_v62 = vpop.f32.mrb[42].mxu1  ;;  %v4250_v37 = vpop.f32.mrb[74].mxu0 }
 0x350   : > { %v3087_v38 = vpack.c.bf16 %v4248_v62, %v4240_v32  ;;  %v3135_v39 = vpack.c.bf16 %v4250_v37, %v4242_v35  ;;  %v4256_v41 = vpop.f32.mrb[43].mxu1  ;;  %v4258_v44 = vpop.f32.mrb[75].mxu0  ;;  %v2635_v32 = vld [vmem:[%s4709_s5 + $0x90] sm:$0xff]  ;;  %v2636_v35 = vld [vmem:[%s4709_s5 + $0x98] sm:$0xff] }
 0x351   : > { %v3085_v47 = vpack.c.bf16 %v4256_v41, %v4244_v40  ;;  %v3133_v49 = vpack.c.bf16 %v4258_v44, %v4246_v56  ;;  %v2637_v40 = vld [vmem:[%s4709_s5 + $0xa0] sm:$0xff]  ;;  %v2638_v56 = vld [vmem:[%s4709_s5 + $0xa8] sm:$0xff]  ;;  %v2639_v62 = vld [vmem:[%s4709_s5 + $0xb0] sm:$0xff] }
 0x352   : > { %v2640_v37 = vld [vmem:[%s4709_s5 + $0xb8] sm:$0xff]  ;;  %v2069_v41 = vld [vmem:[%s4711_s7 + $0x20] sm:$0xff] }
 0x353   : > { %v4264_v51 = vpop.f32.mrb[44].mxu1  ;;  %v4266_v53 = vpop.f32.mrb[76].mxu0 }
 0x354   : > { %v4268_v0 = vpop.f32.mrb[45].mxu1  ;;  %v4270_v8 = vpop.f32.mrb[77].mxu0 }
 0x357   : > { %v4272_v4 = vpop.f32.mrb[46].mxu1  ;;  %v4274_v57 = vpop.f32.mrb[78].mxu0 }
 0x358   : > { %v3091_v61 = vpack.c.bf16 %v4272_v4, %v4264_v51  ;;  %v1289_v5 = vpop.f32.mrb[47].mxu1  ;;  %v4280_v6 = vpop.f32.mrb[79].mxu0  ;;  %v2654_v51 = vld [vmem:[%s4711_s7 + $0xa0] sm:$0xff] }
 0x359   : > { %v3089_v10 = vpack.c.bf16 %v1289_v5, %v4268_v0  ;;  %v3137_v18 = vpack.c.bf16 %v4280_v6, %v4270_v8  ;;  %v2071_v8 = vld [vmem:[%s4711_s7 + $0x30] sm:$0xff] }
 0x35a   : > { %v2656_v6 = vld [vmem:[%s4711_s7 + $0xb0] sm:$0xff] }
 0x35b   : > { %v1399_v22 = vpop.f32.mrb[48].mxu1 }
 0x35c   : > { %v1401_v11 = vpop.f32.mrb[49].mxu1 }
 0x35f   : > { %v1405_v31 = vpop.f32.mrb[50].mxu1 }
 0x360   : > { %v3063_v43 = vpack.c.bf16 %v1405_v31, %v1399_v22  ;;  %v1407_v45 = vpop.f32.mrb[51].mxu1 }
 0x361   : > { %v3061_v46 = vpack.c.bf16 %v1407_v45, %v1401_v11 }
 0x363   : > { %v1411_v48 = vpop.f32.mrb[52].mxu1  ;;  %3062 = vmatprep.subr.bf16.mxu1 %v3061_v46 }
 0x364   : > { %v1413_v52 = vpop.f32.mrb[53].mxu1  ;;  %3064 = vmatpush1.bf16.msra.mxu1 %v3063_v43 }
 0x367   : > { %v1417_v54 = vpop.f32.mrb[54].mxu1 }
 0x368   : > { %v3067_v15 = vpack.c.bf16 %v1417_v54, %v1411_v48  ;;  %v1419_v17 = vpop.f32.mrb[55].mxu1  ;;  %v2577_v48 = vld [vmem:[%s4709_s5 + $0x40] sm:$0xff] }
 0x369   : > { %v3065_v0 = vpack.c.bf16 %v1419_v17, %v1413_v52  ;;  %v2074_v52 = vld [vmem:[%s4711_s7 + $0x48] sm:$0xff] }
 0x36a   : > { %v2659_v17 = vld [vmem:[%s4711_s7 + $0xc8] sm:$0xff] }
 0x36b   : > { %v1423_v5 = vpop.f32.mrb[56].mxu1  ;;  %3066 = vmatprep.subr.bf16.mxu1 %v3065_v0  ;;  %v2075_v0 = vld [vmem:[%s4711_s7 + $0x50] sm:$0xff] }
 0x36c   : > { %v1425_v3 = vpop.f32.mrb[57].mxu1  ;;  %3068 = vmatpush1.bf16.msra.mxu1 %v3067_v15  ;;  %v2658_v15 = vld [vmem:[%s4711_s7 + $0xc0] sm:$0xff] }
 0x36f   : > { %v1429_v28 = vpop.f32.mrb[58].mxu1 }
 0x370   : > { %v3071_v14 = vpack.c.bf16 %v1429_v28, %v1423_v5  ;;  %v1431_v30 = vpop.f32.mrb[59].mxu1  ;;  %v3154_v5 = vpack.c.bf16 %v2659_v17, %v2658_v15  ;;  %v2076_v28 = vld [vmem:[%s4711_s7 + $0x58] sm:$0xff]  ;;  %v2686_v15 = vld [vmem:[%s4711_s7 + $0x1a0] sm:$0xff]  ;;  %v2687_v17 = vld [vmem:[%s4711_s7 + $0x1a8] sm:$0xff] }
 0x371   : > { %v3069_v22 = vpack.c.bf16 %v1431_v30, %v1425_v3  ;;  %v2578_v3 = vld [vmem:[%s4709_s5 + $0x48] sm:$0xff]  ;;  %v2660_v30 = vld [vmem:[%s4711_s7 + $0xd0] sm:$0xff] }
 0x373   : > { %v1435_v31 = vpop.f32.mrb[60].mxu1  ;;  %3070 = vmatprep.subr.bf16.mxu1 %v3069_v22  ;;  %v2661_v22 = vld [vmem:[%s4711_s7 + $0xd8] sm:$0xff] }
 0x374   : > { %v1437_v13 = vpop.f32.mrb[61].mxu1  ;;  %3072 = vmatpush1.bf16.msra.mxu1 %v3071_v14  ;;  %v3181_v14 = vpack.c.bf16 %v2076_v28, %v2075_v0 }
 0x377   : > { %v1441_v11 = vpop.f32.mrb[62].mxu1 }
 0x378   : > { %v3075_v45 = vpack.c.bf16 %v1441_v11, %v1435_v31  ;;  %v1443_v46 = vpop.f32.mrb[63].mxu1  ;;  %v2077_v31 = vld [vmem:[%s4711_s7 + $0x60] sm:$0xff]  ;;  %v3157_v11 = vpack.c.bf16 %v2661_v22, %v2660_v30 }
 0x379   : > { %v3073_v43 = vpack.c.bf16 %v1443_v46, %v1437_v13  ;;  %v2670_v30 = vld [vmem:[%s4711_s7 + $0x120] sm:$0xff] }
 0x37b   : > { %3074 = vmatprep.subr.bf16.mxu1 %v3073_v43  ;;  %v2662_v43 = vld [vmem:[%s4711_s7 + $0xe0] sm:$0xff] }
 0x37c   : > { %3076 = vmatpush1.bf16.msra.mxu1 %v3075_v45  ;;  %v2078_v45 = vld [vmem:[%s4711_s7 + $0x68] sm:$0xff] }
 0x37d   : > { %3078 = vmatprep.subr.bf16.mxu1 %v3077_v16  ;;  %v1293_v16 = vld [vmem:[%s4709_s5 + $0x8] sm:$0xff]  ;;  %v3184_v46 = vpack.c.bf16 %v2078_v45, %v2077_v31  ;;  %v2689_v45 = vld [vmem:[%s4711_s7 + $0x1b8] sm:$0xff] }
 0x37e   : > { %v2671_v31 = vld [vmem:[%s4711_s7 + $0x128] sm:$0xff] }
 0x37f   : > { %2585 = vmatmul.mubr.msk.f32.vlgmr.msra.gmra.mrb[64].mxu1 %vm1455_vm1, %v2577_v48  ;;  %v2663_v48 = vld [vmem:[%s4711_s7 + $0xe8] sm:$0xff] }
 0x380   : > { %3080 = vmatpush1.bf16.msra.mxu1 %v3079_v60  ;;  %1550 = vmatprep.mubr.f32.mxu1 %v3320_v7  ;;  %v2582_v60 = vld [vmem:[%s4709_s5 + $0x68] sm:$0xff] }
 0x381   : > { %3082 = vmatprep.subr.bf16.mxu1 %v3081_v26  ;;  %v2634_v26 = vld [vmem:[%s4709_s5 + $0x88] sm:$0xff] }
 0x383   : > { %2586 = vmatmul.mubr.msk.f32.gmra.mrb[66].mxu1 %vm1455_vm1, %v2578_v3  ;;  %v3160_v3 = vpack.c.bf16 %v2663_v48, %v2662_v43  ;;  %v2672_v48 = vld [vmem:[%s4711_s7 + $0x130] sm:$0xff] }
 0x384   : > { %3084 = vmatpush1.bf16.msra.mxu1 %v3083_v2  ;;  %1556 = vmatprep.mubr.f32.mxu1 %v3320_v7  ;;  %v2633_v2 = vld [vmem:[%s4709_s5 + $0x80] sm:$0xff] }
 0x385   : > { %3086 = vmatprep.subr.bf16.mxu1 %v3085_v47  ;;  %v2070_v47 = vld [vmem:[%s4711_s7 + $0x28] sm:$0xff] }
 0x387   : > { %2587 = vmatmul.mubr.msk.f32.gmra.mrb[68].mxu1 %vm1455_vm1, %v2579_v20  ;;  %v2079_v20 = vld [vmem:[%s4711_s7 + $0x70] sm:$0xff] }
 0x388   : > { %3088 = vmatpush1.bf16.msra.mxu1 %v3087_v38  ;;  %1562 = vmatprep.mubr.f32.mxu1 %v3320_v7  ;;  %v2652_v38 = vld [vmem:[%s4711_s7 + $0x90] sm:$0xff] }
 0x389   : > { %3090 = vmatprep.subr.bf16.mxu1 %v3089_v10  ;;  %v2657_v10 = vld [vmem:[%s4711_s7 + $0xb8] sm:$0xff] }
 0x38a   : > { %v3151_v13 = vpack.c.bf16 %v2657_v10, %v2656_v6  ;;  %v2668_v10 = vld [vmem:[%s4711_s7 + $0x110] sm:$0xff] }
 0x38b   : > { %2588 = vmatmul.mubr.msk.f32.gmra.mrb[70].mxu1 %vm1455_vm1, %v2580_v50  ;;  %v2080_v50 = vld [vmem:[%s4711_s7 + $0x78] sm:$0xff] }
 0x38c   : > { %3092 = vmatpush1.bf16.msra.mxu1 %v3091_v61  ;;  %1568 = vmatprep.mubr.f32.mxu1 %v3320_v7 }
 0x38d   : > { %3126 = vmatprep.subr.bf16.mxu1 %v3125_v19  ;;  %v1296_v19 = vld [vmem:[%s4709_s5 + $0x20] sm:$0xff] }
 0x38f   : > { %2589 = vmatmul.mubr.msk.f32.gmra.mrb[72].mxu1 %vm1455_vm1, %v2581_v55  ;;  %v3187_v55 = vpack.c.bf16 %v2080_v50, %v2079_v20  ;;  %v2691_v20 = vld [vmem:[%s4711_s7 + $0x1c8] sm:$0xff] }
 0x390   : > { %1574 = vmatprep.mubr.f32.mxu1 %v3320_v7 }
 0x393   : > { %2590 = vmatmul.mubr.msk.f32.gmra.mrb[74].mxu1 %vm1455_vm1, %v2582_v60  ;;  %v2664_v60 = vld [vmem:[%s4711_s7 + $0xf0] sm:$0xff] }
 0x394   : > { %1580 = vmatprep.mubr.f32.mxu1 %v3320_v7 }
 0x397   : > { %2591 = vmatmul.mubr.msk.f32.gmra.mrb[76].mxu1 %vm1455_vm1, %v2583_v9  ;;  %v2665_v9 = vld [vmem:[%s4711_s7 + $0xf8] sm:$0xff] }
 0x398   : > { %1586 = vmatprep.mubr.f32.mxu1 %v3320_v7 }
 0x39b   : > { %2592 = vmatmul.mubr.msk.f32.gmra.mrb[78].mxu1 %vm1455_vm1, %v2584_v42  ;;  %v3163_v42 = vpack.c.bf16 %v2665_v9, %v2664_v60  ;;  %v2674_v60 = vld [vmem:[%s4711_s7 + $0x140] sm:$0xff]  ;;  %v2675_v9 = vld [vmem:[%s4711_s7 + $0x148] sm:$0xff] }
 0x39c   : > { %1681 = vmatprep.mubr.f32.mxu1 %v3320_v7 }
 0x39f   : > { %2593 = vmatmul.mubr.msk.f32.vlgmr.msra.gmra.mrb[64].mxu1 %vm1455_vm1, %v1292_v12 }
 0x3a0   : > { %3128 = vmatpush1.bf16.msra.mxu1 %v3127_v63  ;;  %1687 = vmatprep.mubr.f32.mxu1 %v3320_v7  ;;  %v4716_v63 = vpack.c.bf16 %v4274_v57, %v4266_v53  ;;  %v2655_v53 = vld [vmem:[%s4711_s7 + $0xa8] sm:$0xff]  ;;  %v2072_v57 = vld [vmem:[%s4711_s7 + $0x38] sm:$0xff] }
 0x3a1   : > { %3130 = vmatprep.subr.bf16.mxu1 %v3129_v29  ;;  %v3169_v29 = vpack.c.bf16 %v2068_v25, %v2067_v23  ;;  %v3148_v4 = vpack.c.bf16 %v2655_v53, %v2654_v51  ;;  %v3175_v61 = vpack.c.bf16 %v2072_v57, %v2071_v8  ;;  %v2684_v51 = vld [vmem:[%s4711_s7 + $0x190] sm:$0xff]  ;;  %v2685_v53 = vld [vmem:[%s4711_s7 + $0x198] sm:$0xff] }
 0x3a2   : > { %v3217_v6 = vpack.c.bf16 %v2685_v53, %v2684_v51 }
 0x3a3   : > { %2594 = vmatmul.mubr.msk.f32.gmra.mrb[66].mxu1 %vm1455_vm1, %v1293_v16 }
 0x3a4   : > { %3132 = vmatpush1.bf16.msra.mxu1 %v3131_v36  ;;  %1693 = vmatprep.mubr.f32.mxu1 %v3320_v7  ;;  %v3166_v36 = vpack.c.bf16 %v2066_v1, %v2065_v59 }
 0x3a5   : > { %3134 = vmatprep.subr.bf16.mxu1 %v3133_v49  ;;  %v3172_v49 = vpack.c.bf16 %v2070_v47, %v2069_v41 }
 0x3a7   : > { %2595 = vmatmul.mubr.msk.f32.gmra.mrb[68].mxu1 %vm1455_vm1, %v1294_v27 }
 0x3a8   : > { %3136 = vmatpush1.bf16.msra.mxu1 %v3135_v39  ;;  %1699 = vmatprep.mubr.f32.mxu1 %v3320_v7  ;;  %v2653_v39 = vld [vmem:[%s4711_s7 + $0x98] sm:$0xff] }
 0x3a9   : > { %3138 = vmatprep.subr.bf16.mxu1 %v3137_v18  ;;  %v3145_v44 = vpack.c.bf16 %v2653_v39, %v2652_v38  ;;  %v2073_v18 = vld [vmem:[%s4711_s7 + $0x40] sm:$0xff] }
 0x3aa   : > { %v3178_v54 = vpack.c.bf16 %v2074_v52, %v2073_v18  ;;  %v2666_v39 = vld [vmem:[%s4711_s7 + $0x100] sm:$0xff] }
 0x3ab   : > { %2596 = vmatmul.mubr.msk.f32.gmra.mrb[70].mxu1 %vm1455_vm1, %v1295_v58  ;;  %3146 = vmatpush3.bf16.msra.mxu0 %v3145_v44 }
 0x3ac   : > { %3140 = vmatpush1.bf16.msra.mxu1 %v4716_v63  ;;  %1705 = vmatprep.mubr.f32.mxu1 %v3320_v7 }
 0x3ad   : > { %3165 = vmatprep.subr.bf16.mxu1 %v4717_v21  ;;  %3147 = vmatprep.subr.bf16.mxu0 %v4717_v21 }
 0x3af   : > { %2597 = vmatmul.mubr.msk.f32.gmra.mrb[72].mxu1 %vm1455_vm1, %v1296_v19  ;;  %3149 = vmatpush3.bf16.msra.mxu0 %v3148_v4 }
 0x3b0   : > { %1711 = vmatprep.mubr.f32.mxu1 %v3320_v7  ;;  %3150 = vmatprep.subr.bf16.mxu0 %v4717_v21 }
 0x3b3   : > { %2598 = vmatmul.mubr.msk.f32.gmra.mrb[74].mxu1 %vm1455_vm1, %v1297_v24  ;;  %3152 = vmatpush3.bf16.msra.mxu0 %v3151_v13 }
 0x3b4   : > { %1717 = vmatprep.mubr.f32.mxu1 %v3320_v7  ;;  %3153 = vmatprep.subr.bf16.mxu0 %v4717_v21 }
 0x3b7   : > { %2599 = vmatmul.mubr.msk.f32.gmra.mrb[76].mxu1 %vm1455_vm1, %v1298_v33  ;;  %3155 = vmatpush3.bf16.msra.mxu0 %v3154_v5 }
 0x3b8   : > { %1723 = vmatprep.mubr.f32.mxu1 %v3320_v7  ;;  %3156 = vmatprep.subr.bf16.mxu0 %v4717_v21 }
 0x3bb   : > { %2600 = vmatmul.mubr.msk.f32.gmra.mrb[78].mxu1 %vm1455_vm1, %v1299_v34  ;;  %3158 = vmatpush3.bf16.msra.mxu0 %v3157_v11  ;;  %v2688_v11 = vld [vmem:[%s4711_s7 + $0x1b0] sm:$0xff] }
 0x3bc   : > { %1973 = vmatprep.mubr.f32.mxu1 %v3320_v7  ;;  %3159 = vmatprep.subr.bf16.mxu0 %v4717_v21  ;;  %v3223_v43 = vpack.c.bf16 %v2689_v45, %v2688_v11 }
 0x3bf   : > { %2641 = vmatmul.mubr.msk.f32.vlgmr.msra.gmra.mrb[64].mxu1 %vm1455_vm1, %v2633_v2  ;;  %3161 = vmatpush3.bf16.msra.mxu0 %v3160_v3  ;;  %v2673_v3 = vld [vmem:[%s4711_s7 + $0x138] sm:$0xff] }
 0x3c0   : > { %1979 = vmatprep.mubr.f32.mxu1 %v3320_v7  ;;  %3167 = vmatpush3.bf16.msra.mxu1 %v3166_v36  ;;  %v3199_v50 = vpack.c.bf16 %v2673_v3, %v2672_v48 }
 0x3c1   : > { %3168 = vmatprep.subr.bf16.mxu1 %v4717_v21  ;;  %3162 = vmatprep.subr.bf16.mxu0 %v4717_v21 }
 0x3c3   : > { %2642 = vmatmul.mubr.msk.f32.gmra.mrb[66].mxu1 %vm1455_vm1, %v2634_v26  ;;  %3164 = vmatpush3.bf16.msra.mxu0 %v3163_v42  ;;  %v4570_v26 = vld [vmem:[%s4710_s6] ss:$0 sm:$0xff]  ;;  %v2692_v42 = vld [vmem:[%s4711_s7 + $0x1d0] sm:$0xff] }
 0x3c4   : > { %1985 = vmatprep.mubr.f32.mxu1 %v3320_v7  ;;  %3170 = vmatpush3.bf16.msra.mxu1 %v3169_v29 }
 0x3c5   : > { %3171 = vmatprep.subr.bf16.mxu1 %v4717_v21  ;;  %3189 = vmatprep.subr.bf16.mxu0 %v4717_v21 }
 0x3c7   : > { %2643 = vmatmul.mubr.msk.f32.gmra.mrb[68].mxu1 %vm1455_vm1, %v2635_v32 }
 0x3c8   : > { %1991 = vmatprep.mubr.f32.mxu1 %v3320_v7  ;;  %3173 = vmatpush3.bf16.msra.mxu1 %v3172_v49  ;;  %v2667_v49 = vld [vmem:[%s4711_s7 + $0x108] sm:$0xff] }
 0x3c9   : > { %3174 = vmatprep.subr.bf16.mxu1 %v4717_v21 }
 0x3cb   : > { %2644 = vmatmul.mubr.msk.f32.gmra.mrb[70].mxu1 %vm1455_vm1, %v2636_v35  ;;  %v2682_v35 = vld [vmem:[%s4711_s7 + $0x180] sm:$0xff] }
 0x3cc   : > { %1997 = vmatprep.mubr.f32.mxu1 %v3320_v7  ;;  %3176 = vmatpush3.bf16.msra.mxu1 %v3175_v61  ;;  %v3190_v61 = vpack.c.bf16 %v2667_v49, %v2666_v39 }
 0x3cd   : > { %3177 = vmatprep.subr.bf16.mxu1 %v4717_v21 }
 0x3cf   : > { %2645 = vmatmul.mubr.msk.f32.gmra.mrb[72].mxu1 %vm1455_vm1, %v2637_v40  ;;  %v2683_v40 = vld [vmem:[%s4711_s7 + $0x188] sm:$0xff] }
 0x3d0   : > { %2003 = vmatprep.mubr.f32.mxu1 %v3320_v7  ;;  %3179 = vmatpush3.bf16.msra.mxu1 %v3178_v54  ;;  %v3214_v38 = vpack.c.bf16 %v2683_v40, %v2682_v35  ;;  %v2669_v54 = vld [vmem:[%s4711_s7 + $0x118] sm:$0xff] }
 0x3d1   : > { %3180 = vmatprep.subr.bf16.mxu1 %v4717_v21  ;;  %v3193_v28 = vpack.c.bf16 %v2669_v54, %v2668_v10  ;;  %v2681_v35 = vld [vmem:[%s4711_s7 + $0x178] sm:$0xff] }
 0x3d3   : > { %2646 = vmatmul.mubr.msk.f32.gmra.mrb[74].mxu1 %vm1455_vm1, %v2638_v56 }
 0x3d4   : > { %2009 = vmatprep.mubr.f32.mxu1 %v3320_v7  ;;  %3182 = vmatpush3.bf16.msra.mxu1 %v3181_v14  ;;  %v3220_v14 = vpack.c.bf16 %v2687_v17, %v2686_v15 }
 0x3d5   : > { %3183 = vmatprep.subr.bf16.mxu1 %v4717_v21 }
 0x3d7   : > { %2647 = vmatmul.mubr.msk.f32.gmra.mrb[76].mxu1 %vm1455_vm1, %v2639_v62 }
 0x3d8   : > { %2015 = vmatprep.mubr.f32.mxu1 %v3320_v7  ;;  %3185 = vmatpush3.bf16.msra.mxu1 %v3184_v46  ;;  %v3196_v46 = vpack.c.bf16 %v2671_v31, %v2670_v30 }
 0x3d9   : > { %3186 = vmatprep.subr.bf16.mxu1 %v4717_v21 }
 0x3db   : > { %2648 = vmatmul.mubr.msk.f32.gmra.mrb[78].mxu1 %vm1455_vm1, %v2640_v37 }
 0x3dc   : > { %3188 = vmatpush3.bf16.msra.mxu1 %v3187_v55  ;;  %2836 = vmatprep.mubr.msk.f32.mxu1 %vm3322_vm2, %v3320_v7 }
 0x3dd   : > { %3213 = vmatprep.subr.bf16.mxu1 %v4717_v21 }
 0x492   : > { %v1975_v12 = vpop.f32.mrb[64].mxu1 }
 0x493   : > { %v1977_v16 = vpop.f32.mrb[65].mxu1 }
 0x494   : > { %v2038_v27 = vmax.f32 %v1975_v12, %v1977_v16  ;;  %v2693_v12 = vld [vmem:[%s4711_s7 + $0x1d8] sm:$0xff]  ;;  %v3202_v16 = vpack.c.bf16 %v2675_v9, %v2674_v60 }
 0x496   : > { %v1981_v58 = vpop.f32.mrb[66].mxu1 }
 0x497   : > { %v1983_v63 = vpop.f32.mrb[67].mxu1 }
 0x498   : > { %v2039_v19 = vmax.f32 %v1981_v58, %v1983_v63  ;;  %v2676_v58 = vld [vmem:[%s4711_s7 + $0x150] sm:$0xff]  ;;  %v2677_v63 = vld [vmem:[%s4711_s7 + $0x158] sm:$0xff] }
 0x49a   : > { %v1987_v24 = vpop.f32.mrb[68].mxu1 }
 0x49b   : > { %v1989_v33 = vpop.f32.mrb[69].mxu1 }
 0x49c   : > { %v2040_v34 = vmax.f32 %v1987_v24, %v1989_v33  ;;  %v2695_v24 = vld [vmem:[%s4711_s7 + $0x1e8] sm:$0xff]  ;;  %v3205_v33 = vpack.c.bf16 %v2677_v63, %v2676_v58 }
 0x49e   : > { %v1993_v59 = vpop.f32.mrb[70].mxu1 }
 0x49f   : > { %v1995_v1 = vpop.f32.mrb[71].mxu1 }
 0x4a0   : > { %v2041_v2 = vmax.f32 %v1993_v59, %v1995_v1  ;;  %v2678_v59 = vld [vmem:[%s4711_s7 + $0x160] sm:$0xff]  ;;  %v2679_v1 = vld [vmem:[%s4711_s7 + $0x168] sm:$0xff] }
 0x4a2   : > { %v1999_v36 = vpop.f32.mrb[72].mxu1 }
 0x4a3   : > { %v2001_v23 = vpop.f32.mrb[73].mxu1 }
 0x4a4   : > { %v2042_v25 = vmax.f32 %v1999_v36, %v2001_v23  ;;  %v2697_v36 = vld [vmem:[%s4711_s7 + $0x1f8] sm:$0xff]  ;;  %v3208_v23 = vpack.c.bf16 %v2679_v1, %v2678_v59 }
 0x4a6   : > { %v2046_v29 = vmax.f32 %v2038_v27, %v2042_v25  ;;  %v2005_v32 = vpop.f32.mrb[74].mxu1  ;;  %v3229_v27 = vpack.c.bf16 %v2693_v12, %v2692_v42 }
 0x4a7   : > { %v2007_v56 = vpop.f32.mrb[75].mxu1 }
 0x4a8   : > { %v2057_v62 = vadd.f32 %v4570_v26, %v2046_v29  ;;  %v2043_v37 = vmax.f32 %v2005_v32, %v2007_v56  ;;  %v2680_v32 = vld [vmem:[%s4711_s7 + $0x170] sm:$0xff] }
 0x4a9   : > { %v3211_v40 = vpack.c.bf16 %v2681_v35, %v2680_v32 }
 0x4aa   : > { %v2061_v41 = vmax.f32 %v2057_v62, 0.0  ;;  %v2047_v44 = vmax.f32 %v2039_v19, %v2043_v37  ;;  %v2011_v47 = vpop.f32.mrb[76].mxu1  ;;  %v2694_v19 = vld [vmem:[%s4711_s7 + $0x1e0] sm:$0xff] }
 0x4ab   : > { %v2013_v8 = vpop.f32.mrb[77].mxu1 }
 0x4ac   : > { %v2058_v4 = vadd.f32 %v4570_v26, %v2047_v44  ;;  %v2044_v57 = vmax.f32 %v2011_v47, %v2013_v8  ;;  %2837 = vmatmul.mubr.f32.vlgmr.msra.gmra.mrb[80].mxu1 %v2061_v41 }
 0x4ad   : > { %3215 = vmatpush3.bf16.msra.mxu1 %v3214_v38  ;;  %2906 = vmatprep.mubr.msk.f32.mxu1 %vm3322_vm2, %v3320_v7 }
 0x4ae   : > { %v2062_v18 = vmax.f32 %v2058_v4, 0.0  ;;  %v4597_v13 = vmax.f32 %v2040_v34, %v2044_v57  ;;  %v2017_v52 = vpop.f32.mrb[78].mxu1  ;;  %3216 = vmatprep.subr.bf16.mxu1 %v4717_v21  ;;  %v3232_v34 = vpack.c.bf16 %v2695_v24, %v2694_v19 }
 0x4af   : > { %v2019_v0 = vpop.f32.mrb[79].mxu1 }
 0x4b0   : > { %v2045_v5 = vmax.f32 %v2017_v52, %v2019_v0  ;;  %2802 = vmatmul.mubr.f32.vlgmr.msra.gmra.mrb[80].mxu0 %v2062_v18  ;;  %v2059_v56 = vadd.f32 %v4570_v26, %v4597_v13 }
 0x4b1   : > { %3191 = vmatpush3.bf16.msra.mxu0 %v3190_v61  ;;  %3218 = vmatpush3.bf16.msra.mxu1 %v3217_v6 }
 0x4b2   : > { %v2049_v22 = vmax.f32 %v2041_v2, %v2045_v5  ;;  %3192 = vmatprep.subr.bf16.mxu0 %v4717_v21  ;;  %3219 = vmatprep.subr.bf16.mxu1 %v4717_v21  ;;  %v2696_v2 = vld [vmem:[%s4711_s7 + $0x1f0] sm:$0xff]  ;;  %v2063_v37 = vmax.f32 %v2059_v56, 0.0 }
 0x4b3   : > { %2871 = vmatprep.mubr.msk.f32.mxu0 %vm3322_vm2, %v3320_v7  ;;  %v2690_v7 = vld [vmem:[%s4711_s7 + $0x1c0] sm:$0xff]  ;;  %v3235_v25 = vpack.c.bf16 %v2697_v36, %v2696_v2 }
 0x4b4   : > { %v3226_v55 = vpack.c.bf16 %v2691_v20, %v2690_v7  ;;  %v2060_v29 = vadd.f32 %v4570_v26, %v2049_v22 }
 0x4b5   : > { %3194 = vmatpush3.bf16.msra.mxu0 %v3193_v28  ;;  %3221 = vmatpush3.bf16.msra.mxu1 %v3220_v14 }
 0x4b6   : > { %3195 = vmatprep.subr.bf16.mxu0 %v4717_v21  ;;  %3222 = vmatprep.subr.bf16.mxu1 %v4717_v21  ;;  %v2064_v62 = vmax.f32 %v2060_v29, 0.0 }
 0x4b9   : > { %3197 = vmatpush3.bf16.msra.mxu0 %v3196_v46  ;;  %3224 = vmatpush3.bf16.msra.mxu1 %v3223_v43 }
 0x4ba   : > { %3198 = vmatprep.subr.bf16.mxu0 %v4717_v21  ;;  %3225 = vmatprep.subr.bf16.mxu1 %v4717_v21 }
 0x4bd   : > { %3200 = vmatpush3.bf16.msra.mxu0 %v3199_v50  ;;  %3227 = vmatpush3.bf16.msra.mxu1 %v3226_v55 }
 0x4be   : > { %3201 = vmatprep.subr.bf16.mxu0 %v4717_v21  ;;  %3228 = vmatprep.subr.bf16.mxu1 %v4717_v21 }
 0x4c1   : > { %3203 = vmatpush3.bf16.msra.mxu0 %v3202_v16  ;;  %3230 = vmatpush3.bf16.msra.mxu1 %v3229_v27 }
 0x4c2   : > { %3204 = vmatprep.subr.bf16.mxu0 %v4717_v21  ;;  %3231 = vmatprep.subr.bf16.mxu1 %v4717_v21 }
 0x4c5   : > { %3206 = vmatpush3.bf16.msra.mxu0 %v3205_v33  ;;  %3233 = vmatpush3.bf16.msra.mxu1 %v3232_v34 }
 0x4c6   : > { %3207 = vmatprep.subr.bf16.mxu0 %v4717_v21  ;;  %3234 = vmatprep.subr.bf16.mxu1 %v4717_v21 }
 0x4c9   : > { %3209 = vmatpush3.bf16.msra.mxu0 %v3208_v23  ;;  %3236 = vmatpush3.bf16.msra.mxu1 %v3235_v25 }
 0x4ca   : > { %3210 = vmatprep.subr.bf16.mxu0 %v4717_v21  ;;  %v2698_v21 = vld [vmem:[%s4712_s8] ss:$0 sm:$0xff] }
 0x4cc   : > { %2907 = vmatmul.mubr.f32.vlgmr.msra.gmra.mrb[82].mxu1 %v2064_v62 }
 0x4cd   : > { %3212 = vmatpush3.bf16.msra.mxu0 %v3211_v40 }
 0x4d0   : > { %2872 = vmatmul.mubr.f32.vlgmr.msra.gmra.mrb[82].mxu0 %v2063_v37 }
 0x57f   : > { %v2234_v38 = vpop.f32.mrb[80].mxu1 }
 0x580   : > { %v2838_v39 = vpop.f32.mrb[81].mxu1 }
 0x583   : > { %v2164_v41 = vpop.f32.mrb[80].mxu0 }
 0x584   : > { %v2235_v44 = vadd.f32 %v2234_v38, %v2164_v41  ;;  %v2803_v47 = vpop.f32.mrb[81].mxu0 }
 0x59f   : > { %v2409_v49 = vpop.f32.mrb[82].mxu1 }
 0x5a0   : > { %v2908_v51 = vpop.f32.mrb[83].mxu1 }
 0x5a3   : > { %v2321_v53 = vpop.f32.mrb[82].mxu0 }
 0x5a4   : > { %v2325_v8 = vadd.f32 %v2321_v53, %v2235_v44  ;;  %v2873_v26 = vpop.f32.mrb[83].mxu0 }
 0x5a6   : > { %v2413_v4 = vadd.f32 %v2409_v49, %v2325_v8 }
 0x5a8   : > { %v2421_v57 = vadd.f32 %v2698_v21, %v2413_v4 }
 0x5aa   : > { %2422 = vst [vmem:[%s332_s12] sm:$0xff] %v2421_v57 }
 0x5ab PF: > { %s19_s30 = sadd.s32 1, %s3318_s30  }
 0x5ac   : > { %p16_p5 = scmp.ge.s32.totalorder %s19_s30, 4  }
 0x5ae   :  { %18 = sbr.rel (!%p16_p5) target bundleno = 1 (0x1), region = 95 }

</bundles_post_ra>
